<compile_context>
chip_gen: v7x
topology: tpu7x:2x2x1
jax: 0.10.0
libtpu: 0.0.40
codegen_flags: <defaults>
</compile_context>

<pallas_src>
import jax
import jax.numpy as jnp
from jax.experimental import pallas as pl
from jax.experimental.pallas import tpu as pltpu


# ------------------------- static configuration -----------------------------
INPLANES = 64                      # == planes (residual add needs equal dims)
PLANES = 64
SCALE = 8
WIDTH = PLANES // SCALE            # 8
KSIZE = 3
DILATION = 2
PAD = (KSIZE // 2) * DILATION      # 2
NUMS = SCALE - 1                   # 7
CMID = WIDTH * SCALE               # 64
SE_BOTTLENECK = 128
BATCH = 2
SEQ = 16
EPS = 1e-5

# MXU operand dtype.  bf16 operands (with f32 accumulation) cut MXU passes ~3x
# on the strictly-serial 7-group chain; set to jnp.float32 for bit-closer
# numerics against the f32 reference.
MATMUL_DTYPE = jnp.bfloat16

NUM_VEC_ROWS = 16                  # rows of the packed scalar-parameter slab


# ------------------------------- kernel -------------------------------------
def _bottle2neck_kernel(x_ref,      # (B, T, Cin)  f32, channels-last
                        w1_ref,     # (Cin, Cmid)  matmul dtype
                        wg_ref,     # (NUMS, K*W, W)
                        w3_ref,     # (SCALE, W, planes)
                        sew1_ref,   # (planes, bneck)
                        sew2_ref,   # (bneck, planes)
                        vec_ref,    # (16, 128) f32 packed biases / BN affines
                        o_ref):     # (B, T, planes)
    x = x_ref[...].astype(jnp.float32)                     # (B, T, Cin)
    B, T, Cin = x.shape
    xf = x.reshape(B * T, Cin)

    vecs = vec_ref[...]                                    # (16, 128) f32
    b1 = vecs[0:1, :CMID]
    s1 = vecs[1:2, :CMID]
    t1 = vecs[2:3, :CMID]
    b3 = vecs[3:4, :PLANES]
    s3 = vecs[4:5, :PLANES]
    t3 = vecs[5:6, :PLANES]
    seb1 = vecs[6:7, :SE_BOTTLENECK]
    seb2 = vecs[7:8, :PLANES]

    # ---- conv1 (1x1) -> ReLU -> BN1 (folded scale/shift) ----
    h = jnp.dot(xf.astype(MATMUL_DTYPE), w1_ref[...],
                preferred_element_type=jnp.float32)
    h = jnp.maximum(h + b1, 0.0) * s1 + t1                 # (B*T, Cmid)

    # ---- conv3 accumulated incrementally (no lane concat at the end) ----
    # Pass-through group (last SCALE-th slice) contributes first.
    sp_last = h[:, NUMS * WIDTH:CMID]                      # (B*T, W)
    z = jnp.dot(sp_last.astype(MATMUL_DTYPE), w3_ref[SCALE - 1],
                preferred_element_type=jnp.float32)        # (B*T, planes)

    # ---- Res2Net hierarchical groups (serial chain) ----
    h3 = h.reshape(B, T, CMID)
    zpad = jnp.zeros((B, PAD, WIDTH), jnp.float32)         # loop-invariant
    sp = None
    for i in range(NUMS):
        spx_i = h3[:, :, i * WIDTH:(i + 1) * WIDTH]        # (B, T, W)
        sp = spx_i if i == 0 else sp + spx_i
        # Dilated K=3 "same" conv == ONE matmul over 3 stacked time-shifted taps.
        sp_pad = jnp.concatenate([zpad, sp, zpad], axis=1)            # (B, T+2P, W)
        stacked = jnp.concatenate(
            [sp_pad[:, k * DILATION:k * DILATION + T, :] for k in range(KSIZE)],
            axis=-1).reshape(B * T, KSIZE * WIDTH)                    # (B*T, 3W)
        y = jnp.dot(stacked.astype(MATMUL_DTYPE), wg_ref[i],
                    preferred_element_type=jnp.float32)               # (B*T, W)
        bg = vecs[8 + i:9 + i, 0:WIDTH]
        sg = vecs[8 + i:9 + i, WIDTH:2 * WIDTH]
        tg = vecs[8 + i:9 + i, 2 * WIDTH:3 * WIDTH]
        y = jnp.maximum(y + bg, 0.0) * sg + tg             # ReLU -> BN_i (folded)
        # conv3 partial product for this group (off the serial chain).
        z = z + jnp.dot(y.astype(MATMUL_DTYPE), w3_ref[i],
                        preferred_element_type=jnp.float32)
        sp = y.reshape(B, T, WIDTH)

    # ---- conv3 bias -> ReLU -> BN3 ----
    z = jnp.maximum(z + b3, 0.0) * s3 + t3                 # (B*T, planes)
    z3 = z.reshape(B, T, PLANES)

    # ---- SE: mean over time -> FC -> ReLU -> FC -> sigmoid ----
    m = jnp.mean(z3, axis=1)                               # (B, planes)
    s = jnp.dot(m.astype(MATMUL_DTYPE), sew1_ref[...],
                preferred_element_type=jnp.float32) + seb1
    s = jnp.maximum(s, 0.0)
    g = jnp.dot(s.astype(MATMUL_DTYPE), sew2_ref[...],
                preferred_element_type=jnp.float32) + seb2
    gate = jax.nn.sigmoid(g)                               # (B, planes)

    out = z3 * gate[:, None, :] + x                        # SE scale + residual
    o_ref[...] = out.astype(o_ref.dtype)


# ------------------------------- wrapper -------------------------------------
def _use_batch_grid(batch):
    """Split batch across TensorCores only on dual-core chips (v7x)."""
    if batch < 2:
        return False
    try:
        kind = jax.devices()[0].device_kind.lower()
    except Exception:
        return False
    return ("v7" in kind) or ("7x" in kind)


def bottle2neck_forward(x, params):
    """x: (B, C, T) float32 -> (B, C, T). BatchNorm in inference mode."""
    B, C, T = x.shape

    def fold_bn(g, b, m, v):
        s = g / jnp.sqrt(v + EPS)
        return s, b - m * s

    bn1s, bn1b = fold_bn(params["bn1_g"], params["bn1_b"], params["bn1_m"], params["bn1_v"])
    bn3s, bn3b = fold_bn(params["bn3_g"], params["bn3_b"], params["bn3_m"], params["bn3_v"])
    bngs, bngb = fold_bn(params["bng_g"], params["bng_b"], params["bng_m"], params["bng_v"])

    # ---- weight prep (trace-time, once): transpose + pack + cast ----
    w1_t = params["w1"][:, :, 0].T.astype(MATMUL_DTYPE)                 # (Cin, Cmid)
    # group conv weights (NUMS, Wout, Win, K) -> (NUMS, K*Win, Wout): fused taps.
    wg_packed = jnp.transpose(params["wg"], (0, 3, 2, 1)).reshape(
        NUMS, KSIZE * WIDTH, WIDTH).astype(MATMUL_DTYPE)
    # conv3 weight pre-sliced per Res2Net group: (SCALE, Win=W, planes).
    w3_slices = jnp.transpose(
        params["w3"][:, :, 0].reshape(PLANES, SCALE, WIDTH), (1, 2, 0)
    ).astype(MATMUL_DTYPE)
    sew1_t = params["se_w1"][:, :, 0].T.astype(MATMUL_DTYPE)            # (planes, bneck)
    sew2_t = params["se_w2"][:, :, 0].T.astype(MATMUL_DTYPE)            # (bneck, planes)

    # ---- pack every small bias / BN vector into ONE lane-dense f32 slab ----
    vec = jnp.zeros((NUM_VEC_ROWS, 128), jnp.float32)
    vec = vec.at[0, :CMID].set(params["b1"])
    vec = vec.at[1, :CMID].set(bn1s)
    vec = vec.at[2, :CMID].set(bn1b)
    vec = vec.at[3, :PLANES].set(params["b3"])
    vec = vec.at[4, :PLANES].set(bn3s)
    vec = vec.at[5, :PLANES].set(bn3b)
    vec = vec.at[6, :SE_BOTTLENECK].set(params["se_b1"])
    vec = vec.at[7, :PLANES].set(params["se_b2"])
    vec = vec.at[8:8 + NUMS, 0:WIDTH].set(params["bg"])
    vec = vec.at[8:8 + NUMS, WIDTH:2 * WIDTH].set(bngs)
    vec = vec.at[8:8 + NUMS, 2 * WIDTH:3 * WIDTH].set(bngb)

    x_btc = jnp.transpose(x, (0, 2, 1))                    # channels-last (tiny)
    args = (x_btc, w1_t, wg_packed, w3_slices, sew1_t, sew2_t, vec)
    out_shape = jax.ShapeDtypeStruct((B, T, PLANES), x.dtype)

    if _use_batch_grid(B):
        # v7x: one batch element per TensorCore via a "parallel" batch grid.
        def full_spec(a):
            return pl.BlockSpec(a.shape, lambda b, _nd=a.ndim: (0,) * _nd)
        in_specs = [pl.BlockSpec((1, T, C), lambda b: (b, 0, 0))]
        in_specs += [full_spec(a) for a in args[1:]]
        out = pl.pallas_call(
            _bottle2neck_kernel,
            out_shape=out_shape,
            grid=(B,),
            in_specs=in_specs,
            out_specs=pl.BlockSpec((1, T, PLANES), lambda b: (b, 0, 0)),
            compiler_params=pltpu.CompilerParams(
                dimension_semantics=("parallel",)),
        )(*args)
    else:
        # v5e / v6e: single TensorCore -> one grid-free invocation
        # (footprint << VMEM; per-step grid overhead would only add latency).
        vmem = pl.BlockSpec(memory_space=pltpu.MemorySpace.VMEM)
        out = pl.pallas_call(
            _bottle2neck_kernel,
            out_shape=out_shape,
            in_specs=[vmem] * len(args),
            out_specs=vmem,
        )(*args)
    return jnp.transpose(out, (0, 2, 1))                   # back to (B, C, T)


# ------------------------ pure-JAX reference (sanity) -------------------------
def reference(x, p):
    relu = lambda v: jnp.maximum(v, 0.0)
    T = x.shape[2]

    def conv1x1(v, w, b):
        return jnp.einsum("oc,bct->bot", w[:, :, 0], v) + b[None, :, None]

    def bn(v, g, b, m, var):
        s = g / jnp.sqrt(var + EPS)
        return v * s[None, :, None] + (b - m * s)[None, :, None]

    out = bn(relu(conv1x1(x, p["w1"], p["b1"])),
             p["bn1_g"], p["bn1_b"], p["bn1_m"], p["bn1_v"])
    spx = [out[:, i * WIDTH:(i + 1) * WIDTH, :] for i in range(SCALE)]
    pieces = []
    sp = None
    for i in range(NUMS):
        sp = spx[i] if i == 0 else sp + spx[i]
        w = p["wg"][i]                                        # (W, W, K)
        sp_pad = jnp.pad(sp, ((0, 0), (0, 0), (PAD, PAD)))
        y = sum(jnp.einsum("oc,bct->bot", w[:, :, k],
                           sp_pad[:, :, k * DILATION:k * DILATION + T])
                for k in range(KSIZE)) + p["bg"][i][None, :, None]
        sp = bn(relu(y), p["bng_g"][i], p["bng_b"][i], p["bng_m"][i], p["bng_v"][i])
        pieces.append(sp)
    pieces.append(spx[NUMS])
    out = jnp.concatenate(pieces, axis=1)
    out = bn(relu(conv1x1(out, p["w3"], p["b3"])),
             p["bn3_g"], p["bn3_b"], p["bn3_m"], p["bn3_v"])
    m = out.mean(axis=2, keepdims=True)
    s = relu(jnp.einsum("oc,bcu->bou", p["se_w1"][:, :, 0], m) + p["se_b1"][None, :, None])
    s = jax.nn.sigmoid(jnp.einsum("oc,bcu->bou", p["se_w2"][:, :, 0], s) + p["se_b2"][None, :, None])
    return out * s + x


# --------------------------------- main ---------------------------------------
if __name__ == "__main__":
    key = jax.random.PRNGKey(0)
    ks = iter(jax.random.split(key, 32))

    params = {
        "w1": 0.1 * jax.random.normal(next(ks), (CMID, INPLANES, 1), jnp.float32),
        "b1": 0.01 * jax.random.normal(next(ks), (CMID,), jnp.float32),
        "bn1_g": 1.0 + 0.1 * jax.random.normal(next(ks), (CMID,), jnp.float32),
        "bn1_b": 0.01 * jax.random.normal(next(ks), (CMID,), jnp.float32),
        "bn1_m": 0.1 * jax.random.normal(next(ks), (CMID,), jnp.float32),
        "bn1_v": 0.5 + jax.random.uniform(next(ks), (CMID,), jnp.float32),
        "wg": 0.1 * jax.random.normal(next(ks), (NUMS, WIDTH, WIDTH, KSIZE), jnp.float32),
        "bg": 0.01 * jax.random.normal(next(ks), (NUMS, WIDTH), jnp.float32),
        "bng_g": 1.0 + 0.1 * jax.random.normal(next(ks), (NUMS, WIDTH), jnp.float32),
        "bng_b": 0.01 * jax.random.normal(next(ks), (NUMS, WIDTH), jnp.float32),
        "bng_m": 0.1 * jax.random.normal(next(ks), (NUMS, WIDTH), jnp.float32),
        "bng_v": 0.5 + jax.random.uniform(next(ks), (NUMS, WIDTH), jnp.float32),
        "w3": 0.1 * jax.random.normal(next(ks), (PLANES, CMID, 1), jnp.float32),
        "b3": 0.01 * jax.random.normal(next(ks), (PLANES,), jnp.float32),
        "bn3_g": 1.0 + 0.1 * jax.random.normal(next(ks), (PLANES,), jnp.float32),
        "bn3_b": 0.01 * jax.random.normal(next(ks), (PLANES,), jnp.float32),
        "bn3_m": 0.1 * jax.random.normal(next(ks), (PLANES,), jnp.float32),
        "bn3_v": 0.5 + jax.random.uniform(next(ks), (PLANES,), jnp.float32),
        "se_w1": 0.1 * jax.random.normal(next(ks), (SE_BOTTLENECK, PLANES, 1), jnp.float32),
        "se_b1": 0.01 * jax.random.normal(next(ks), (SE_BOTTLENECK,), jnp.float32),
        "se_w2": 0.1 * jax.random.normal(next(ks), (PLANES, SE_BOTTLENECK, 1), jnp.float32),
        "se_b2": 0.01 * jax.random.normal(next(ks), (PLANES,), jnp.float32),
    }

    x = jax.random.normal(next(ks), (BATCH, INPLANES, SEQ), jnp.float32)

    out = bottle2neck_forward(x, params)
    out = jax.block_until_ready(out)
    ref = reference(x, params)

    assert out.shape == (BATCH, PLANES, SEQ)
    assert bool(jnp.all(jnp.isfinite(out)))
    # bf16 MXU operands (f32 accumulation) vs the pure-f32 reference need a
    # loosened tolerance; with MATMUL_DTYPE = jnp.float32 use 1e-3.
    tol = 5e-2 if MATMUL_DTYPE == jnp.bfloat16 else 1e-3
    assert bool(jnp.allclose(out, ref, atol=tol, rtol=tol)), "mismatch vs reference"
    print("KERNEL_OK")
</pallas_src>

<mosaic_0001>
module attributes {stable_mosaic.version = 11 : i64} {
  func.func @_bottle2neck_kernel(%arg0: memref<2x16x64xf32, #tpu.memory_space<vmem>>, %arg1: memref<64x64xbf16, #tpu.memory_space<vmem>>, %arg2: memref<7x24x8xbf16, #tpu.memory_space<vmem>>, %arg3: memref<8x8x64xbf16, #tpu.memory_space<vmem>>, %arg4: memref<64x128xbf16, #tpu.memory_space<vmem>>, %arg5: memref<128x64xbf16, #tpu.memory_space<vmem>>, %arg6: memref<16x128xf32, #tpu.memory_space<vmem>>, %arg7: memref<2x16x64xf32, #tpu.memory_space<vmem>>) attributes {dimension_semantics = [], scalar_prefetch = 0 : i64, scratch_operands = 0 : i64, tpu.core_type = #tpu.core_type<tc>} {
    %c0 = arith.constant 0 : index
    %c0_0 = arith.constant 0 : index
    %c0_1 = arith.constant 0 : index
    %0 = vector.load %arg0[%c0, %c0_0, %c0_1] : memref<2x16x64xf32, #tpu.memory_space<vmem>>, vector<2x16x64xf32>
    %1 = vector.shape_cast %0 : vector<2x16x64xf32> to vector<32x64xf32>
    %c0_2 = arith.constant 0 : index
    %c0_3 = arith.constant 0 : index
    %2 = vector.load %arg6[%c0_2, %c0_3] : memref<16x128xf32, #tpu.memory_space<vmem>>, vector<16x128xf32>
    %3 = vector.extract_strided_slice %2 {offsets = [0, 0], sizes = [1, 64], strides = [1, 1]} : vector<16x128xf32> to vector<1x64xf32>
    %4 = vector.extract_strided_slice %2 {offsets = [1, 0], sizes = [1, 64], strides = [1, 1]} : vector<16x128xf32> to vector<1x64xf32>
    %5 = vector.extract_strided_slice %2 {offsets = [2, 0], sizes = [1, 64], strides = [1, 1]} : vector<16x128xf32> to vector<1x64xf32>
    %6 = vector.extract_strided_slice %2 {offsets = [3, 0], sizes = [1, 64], strides = [1, 1]} : vector<16x128xf32> to vector<1x64xf32>
    %7 = vector.extract_strided_slice %2 {offsets = [4, 0], sizes = [1, 64], strides = [1, 1]} : vector<16x128xf32> to vector<1x64xf32>
    %8 = vector.extract_strided_slice %2 {offsets = [5, 0], sizes = [1, 64], strides = [1, 1]} : vector<16x128xf32> to vector<1x64xf32>
    %9 = vector.extract_strided_slice %2 {offsets = [6, 0], sizes = [1, 128], strides = [1, 1]} : vector<16x128xf32> to vector<1x128xf32>
    %10 = vector.extract_strided_slice %2 {offsets = [7, 0], sizes = [1, 64], strides = [1, 1]} : vector<16x128xf32> to vector<1x64xf32>
    %11 = arith.truncf %1 : vector<32x64xf32> to vector<32x64xbf16>
    %c0_4 = arith.constant 0 : index
    %c0_5 = arith.constant 0 : index
    %12 = vector.load %arg1[%c0_4, %c0_5] : memref<64x64xbf16, #tpu.memory_space<vmem>>, vector<64x64xbf16>
    %cst = arith.constant dense<0.000000e+00> : vector<32x64xf32>
    %13 = tpu.matmul %11, %12, %cst {dimension_numbers = #tpu.dot_dimension_numbers<[1], [0], [0], [1], [0, 0, 1, 1], [], []>} : vector<32x64xbf16>, vector<64x64xbf16>, vector<32x64xf32> -> vector<32x64xf32>
    %14 = vector.broadcast %3 : vector<1x64xf32> to vector<32x64xf32>
    %15 = arith.addf %13, %14 : vector<32x64xf32>
    %cst_6 = arith.constant 0.000000e+00 : f32
    %16 = vector.broadcast %cst_6 : f32 to vector<32x64xf32>
    %17 = arith.maximumf %15, %16 : vector<32x64xf32>
    %18 = vector.broadcast %4 : vector<1x64xf32> to vector<32x64xf32>
    %19 = arith.mulf %17, %18 : vector<32x64xf32>
    %20 = vector.broadcast %5 : vector<1x64xf32> to vector<32x64xf32>
    %21 = arith.addf %19, %20 : vector<32x64xf32>
    %22 = vector.extract_strided_slice %21 {offsets = [0, 56], sizes = [32, 8], strides = [1, 1]} : vector<32x64xf32> to vector<32x8xf32>
    %23 = arith.truncf %22 : vector<32x8xf32> to vector<32x8xbf16>
    %c7 = arith.constant 7 : index
    %c0_7 = arith.constant 0 : index
    %c0_8 = arith.constant 0 : index
    %24 = vector.load %arg3[%c7, %c0_7, %c0_8] : memref<8x8x64xbf16, #tpu.memory_space<vmem>>, vector<1x8x64xbf16>
    %25 = vector.shape_cast %24 : vector<1x8x64xbf16> to vector<8x64xbf16>
    %cst_9 = arith.constant dense<0.000000e+00> : vector<32x64xf32>
    %26 = tpu.matmul %23, %25, %cst_9 {dimension_numbers = #tpu.dot_dimension_numbers<[1], [0], [0], [1], [0, 0, 1, 1], [], []>} : vector<32x8xbf16>, vector<8x64xbf16>, vector<32x64xf32> -> vector<32x64xf32>
    %27 = vector.shape_cast %21 : vector<32x64xf32> to vector<2x16x64xf32>
    %cst_10 = arith.constant 0.000000e+00 : f32
    %28 = vector.broadcast %cst_10 : f32 to vector<2x2x8xf32>
    %29 = vector.extract_strided_slice %27 {offsets = [0, 0, 0], sizes = [2, 16, 8], strides = [1, 1, 1]} : vector<2x16x64xf32> to vector<2x16x8xf32>
    %30 = tpu.concatenate %28, %29, %28 in 1 : vector<2x2x8xf32>, vector<2x16x8xf32>, vector<2x2x8xf32> -> vector<2x20x8xf32>
    %31 = vector.extract_strided_slice %30 {offsets = [0, 0, 0], sizes = [2, 16, 8], strides = [1, 1, 1]} : vector<2x20x8xf32> to vector<2x16x8xf32>
    %32 = vector.extract_strided_slice %30 {offsets = [0, 2, 0], sizes = [2, 16, 8], strides = [1, 1, 1]} : vector<2x20x8xf32> to vector<2x16x8xf32>
    %33 = vector.extract_strided_slice %30 {offsets = [0, 4, 0], sizes = [2, 16, 8], strides = [1, 1, 1]} : vector<2x20x8xf32> to vector<2x16x8xf32>
    %34 = tpu.concatenate %31, %32, %33 in 2 : vector<2x16x8xf32>, vector<2x16x8xf32>, vector<2x16x8xf32> -> vector<2x16x24xf32>
    %35 = vector.shape_cast %34 : vector<2x16x24xf32> to vector<32x24xf32>
    %36 = arith.truncf %35 : vector<32x24xf32> to vector<32x24xbf16>
    %c0_11 = arith.constant 0 : index
    %c0_12 = arith.constant 0 : index
    %c0_13 = arith.constant 0 : index
    %37 = vector.load %arg2[%c0_11, %c0_12, %c0_13] : memref<7x24x8xbf16, #tpu.memory_space<vmem>>, vector<1x24x8xbf16>
    %38 = vector.shape_cast %37 : vector<1x24x8xbf16> to vector<24x8xbf16>
    %cst_14 = arith.constant dense<0.000000e+00> : vector<32x8xf32>
    %39 = tpu.matmul %36, %38, %cst_14 {dimension_numbers = #tpu.dot_dimension_numbers<[1], [0], [0], [1], [0, 0, 1, 1], [], []>} : vector<32x24xbf16>, vector<24x8xbf16>, vector<32x8xf32> -> vector<32x8xf32>
    %40 = vector.extract_strided_slice %2 {offsets = [8, 0], sizes = [1, 8], strides = [1, 1]} : vector<16x128xf32> to vector<1x8xf32>
    %41 = vector.extract_strided_slice %2 {offsets = [8, 8], sizes = [1, 8], strides = [1, 1]} : vector<16x128xf32> to vector<1x8xf32>
    %42 = vector.extract_strided_slice %2 {offsets = [8, 16], sizes = [1, 8], strides = [1, 1]} : vector<16x128xf32> to vector<1x8xf32>
    %43 = vector.broadcast %40 : vector<1x8xf32> to vector<32x8xf32>
    %44 = arith.addf %39, %43 : vector<32x8xf32>
    %cst_15 = arith.constant 0.000000e+00 : f32
    %45 = vector.broadcast %cst_15 : f32 to vector<32x8xf32>
    %46 = arith.maximumf %44, %45 : vector<32x8xf32>
    %47 = vector.broadcast %41 : vector<1x8xf32> to vector<32x8xf32>
    %48 = arith.mulf %46, %47 : vector<32x8xf32>
    %49 = vector.broadcast %42 : vector<1x8xf32> to vector<32x8xf32>
    %50 = arith.addf %48, %49 : vector<32x8xf32>
    %51 = arith.truncf %50 : vector<32x8xf32> to vector<32x8xbf16>
    %c0_16 = arith.constant 0 : index
    %c0_17 = arith.constant 0 : index
    %c0_18 = arith.constant 0 : index
    %52 = vector.load %arg3[%c0_16, %c0_17, %c0_18] : memref<8x8x64xbf16, #tpu.memory_space<vmem>>, vector<1x8x64xbf16>
    %53 = vector.shape_cast %52 : vector<1x8x64xbf16> to vector<8x64xbf16>
    %cst_19 = arith.constant dense<0.000000e+00> : vector<32x64xf32>
    %54 = tpu.matmul %51, %53, %cst_19 {dimension_numbers = #tpu.dot_dimension_numbers<[1], [0], [0], [1], [0, 0, 1, 1], [], []>} : vector<32x8xbf16>, vector<8x64xbf16>, vector<32x64xf32> -> vector<32x64xf32>
    %55 = arith.addf %26, %54 : vector<32x64xf32>
    %56 = vector.shape_cast %50 : vector<32x8xf32> to vector<2x16x8xf32>
    %57 = vector.extract_strided_slice %27 {offsets = [0, 0, 8], sizes = [2, 16, 8], strides = [1, 1, 1]} : vector<2x16x64xf32> to vector<2x16x8xf32>
    %58 = arith.addf %56, %57 : vector<2x16x8xf32>
    %59 = tpu.concatenate %28, %58, %28 in 1 : vector<2x2x8xf32>, vector<2x16x8xf32>, vector<2x2x8xf32> -> vector<2x20x8xf32>
    %60 = vector.extract_strided_slice %59 {offsets = [0, 0, 0], sizes = [2, 16, 8], strides = [1, 1, 1]} : vector<2x20x8xf32> to vector<2x16x8xf32>
    %61 = vector.extract_strided_slice %59 {offsets = [0, 2, 0], sizes = [2, 16, 8], strides = [1, 1, 1]} : vector<2x20x8xf32> to vector<2x16x8xf32>
    %62 = vector.extract_strided_slice %59 {offsets = [0, 4, 0], sizes = [2, 16, 8], strides = [1, 1, 1]} : vector<2x20x8xf32> to vector<2x16x8xf32>
    %63 = tpu.concatenate %60, %61, %62 in 2 : vector<2x16x8xf32>, vector<2x16x8xf32>, vector<2x16x8xf32> -> vector<2x16x24xf32>
    %64 = vector.shape_cast %63 : vector<2x16x24xf32> to vector<32x24xf32>
    %65 = arith.truncf %64 : vector<32x24xf32> to vector<32x24xbf16>
    %c1 = arith.constant 1 : index
    %c0_20 = arith.constant 0 : index
    %c0_21 = arith.constant 0 : index
    %66 = vector.load %arg2[%c1, %c0_20, %c0_21] : memref<7x24x8xbf16, #tpu.memory_space<vmem>>, vector<1x24x8xbf16>
    %67 = vector.shape_cast %66 : vector<1x24x8xbf16> to vector<24x8xbf16>
    %cst_22 = arith.constant dense<0.000000e+00> : vector<32x8xf32>
    %68 = tpu.matmul %65, %67, %cst_22 {dimension_numbers = #tpu.dot_dimension_numbers<[1], [0], [0], [1], [0, 0, 1, 1], [], []>} : vector<32x24xbf16>, vector<24x8xbf16>, vector<32x8xf32> -> vector<32x8xf32>
    %69 = vector.extract_strided_slice %2 {offsets = [9, 0], sizes = [1, 8], strides = [1, 1]} : vector<16x128xf32> to vector<1x8xf32>
    %70 = vector.extract_strided_slice %2 {offsets = [9, 8], sizes = [1, 8], strides = [1, 1]} : vector<16x128xf32> to vector<1x8xf32>
    %71 = vector.extract_strided_slice %2 {offsets = [9, 16], sizes = [1, 8], strides = [1, 1]} : vector<16x128xf32> to vector<1x8xf32>
    %72 = vector.broadcast %69 : vector<1x8xf32> to vector<32x8xf32>
    %73 = arith.addf %68, %72 : vector<32x8xf32>
    %cst_23 = arith.constant 0.000000e+00 : f32
    %74 = vector.broadcast %cst_23 : f32 to vector<32x8xf32>
    %75 = arith.maximumf %73, %74 : vector<32x8xf32>
    %76 = vector.broadcast %70 : vector<1x8xf32> to vector<32x8xf32>
    %77 = arith.mulf %75, %76 : vector<32x8xf32>
    %78 = vector.broadcast %71 : vector<1x8xf32> to vector<32x8xf32>
    %79 = arith.addf %77, %78 : vector<32x8xf32>
    %80 = arith.truncf %79 : vector<32x8xf32> to vector<32x8xbf16>
    %c1_24 = arith.constant 1 : index
    %c0_25 = arith.constant 0 : index
    %c0_26 = arith.constant 0 : index
    %81 = vector.load %arg3[%c1_24, %c0_25, %c0_26] : memref<8x8x64xbf16, #tpu.memory_space<vmem>>, vector<1x8x64xbf16>
    %82 = vector.shape_cast %81 : vector<1x8x64xbf16> to vector<8x64xbf16>
    %cst_27 = arith.constant dense<0.000000e+00> : vector<32x64xf32>
    %83 = tpu.matmul %80, %82, %cst_27 {dimension_numbers = #tpu.dot_dimension_numbers<[1], [0], [0], [1], [0, 0, 1, 1], [], []>} : vector<32x8xbf16>, vector<8x64xbf16>, vector<32x64xf32> -> vector<32x64xf32>
    %84 = arith.addf %55, %83 : vector<32x64xf32>
    %85 = vector.shape_cast %79 : vector<32x8xf32> to vector<2x16x8xf32>
    %86 = vector.extract_strided_slice %27 {offsets = [0, 0, 16], sizes = [2, 16, 8], strides = [1, 1, 1]} : vector<2x16x64xf32> to vector<2x16x8xf32>
    %87 = arith.addf %85, %86 : vector<2x16x8xf32>
    %88 = tpu.concatenate %28, %87, %28 in 1 : vector<2x2x8xf32>, vector<2x16x8xf32>, vector<2x2x8xf32> -> vector<2x20x8xf32>
    %89 = vector.extract_strided_slice %88 {offsets = [0, 0, 0], sizes = [2, 16, 8], strides = [1, 1, 1]} : vector<2x20x8xf32> to vector<2x16x8xf32>
    %90 = vector.extract_strided_slice %88 {offsets = [0, 2, 0], sizes = [2, 16, 8], strides = [1, 1, 1]} : vector<2x20x8xf32> to vector<2x16x8xf32>
    %91 = vector.extract_strided_slice %88 {offsets = [0, 4, 0], sizes = [2, 16, 8], strides = [1, 1, 1]} : vector<2x20x8xf32> to vector<2x16x8xf32>
    %92 = tpu.concatenate %89, %90, %91 in 2 : vector<2x16x8xf32>, vector<2x16x8xf32>, vector<2x16x8xf32> -> vector<2x16x24xf32>
    %93 = vector.shape_cast %92 : vector<2x16x24xf32> to vector<32x24xf32>
    %94 = arith.truncf %93 : vector<32x24xf32> to vector<32x24xbf16>
    %c2 = arith.constant 2 : index
    %c0_28 = arith.constant 0 : index
    %c0_29 = arith.constant 0 : index
    %95 = vector.load %arg2[%c2, %c0_28, %c0_29] : memref<7x24x8xbf16, #tpu.memory_space<vmem>>, vector<1x24x8xbf16>
    %96 = vector.shape_cast %95 : vector<1x24x8xbf16> to vector<24x8xbf16>
    %cst_30 = arith.constant dense<0.000000e+00> : vector<32x8xf32>
    %97 = tpu.matmul %94, %96, %cst_30 {dimension_numbers = #tpu.dot_dimension_numbers<[1], [0], [0], [1], [0, 0, 1, 1], [], []>} : vector<32x24xbf16>, vector<24x8xbf16>, vector<32x8xf32> -> vector<32x8xf32>
    %98 = vector.extract_strided_slice %2 {offsets = [10, 0], sizes = [1, 8], strides = [1, 1]} : vector<16x128xf32> to vector<1x8xf32>
    %99 = vector.extract_strided_slice %2 {offsets = [10, 8], sizes = [1, 8], strides = [1, 1]} : vector<16x128xf32> to vector<1x8xf32>
    %100 = vector.extract_strided_slice %2 {offsets = [10, 16], sizes = [1, 8], strides = [1, 1]} : vector<16x128xf32> to vector<1x8xf32>
    %101 = vector.broadcast %98 : vector<1x8xf32> to vector<32x8xf32>
    %102 = arith.addf %97, %101 : vector<32x8xf32>
    %cst_31 = arith.constant 0.000000e+00 : f32
    %103 = vector.broadcast %cst_31 : f32 to vector<32x8xf32>
    %104 = arith.maximumf %102, %103 : vector<32x8xf32>
    %105 = vector.broadcast %99 : vector<1x8xf32> to vector<32x8xf32>
    %106 = arith.mulf %104, %105 : vector<32x8xf32>
    %107 = vector.broadcast %100 : vector<1x8xf32> to vector<32x8xf32>
    %108 = arith.addf %106, %107 : vector<32x8xf32>
    %109 = arith.truncf %108 : vector<32x8xf32> to vector<32x8xbf16>
    %c2_32 = arith.constant 2 : index
    %c0_33 = arith.constant 0 : index
    %c0_34 = arith.constant 0 : index
    %110 = vector.load %arg3[%c2_32, %c0_33, %c0_34] : memref<8x8x64xbf16, #tpu.memory_space<vmem>>, vector<1x8x64xbf16>
    %111 = vector.shape_cast %110 : vector<1x8x64xbf16> to vector<8x64xbf16>
    %cst_35 = arith.constant dense<0.000000e+00> : vector<32x64xf32>
    %112 = tpu.matmul %109, %111, %cst_35 {dimension_numbers = #tpu.dot_dimension_numbers<[1], [0], [0], [1], [0, 0, 1, 1], [], []>} : vector<32x8xbf16>, vector<8x64xbf16>, vector<32x64xf32> -> vector<32x64xf32>
    %113 = arith.addf %84, %112 : vector<32x64xf32>
    %114 = vector.shape_cast %108 : vector<32x8xf32> to vector<2x16x8xf32>
    %115 = vector.extract_strided_slice %27 {offsets = [0, 0, 24], sizes = [2, 16, 8], strides = [1, 1, 1]} : vector<2x16x64xf32> to vector<2x16x8xf32>
    %116 = arith.addf %114, %115 : vector<2x16x8xf32>
    %117 = tpu.concatenate %28, %116, %28 in 1 : vector<2x2x8xf32>, vector<2x16x8xf32>, vector<2x2x8xf32> -> vector<2x20x8xf32>
    %118 = vector.extract_strided_slice %117 {offsets = [0, 0, 0], sizes = [2, 16, 8], strides = [1, 1, 1]} : vector<2x20x8xf32> to vector<2x16x8xf32>
    %119 = vector.extract_strided_slice %117 {offsets = [0, 2, 0], sizes = [2, 16, 8], strides = [1, 1, 1]} : vector<2x20x8xf32> to vector<2x16x8xf32>
    %120 = vector.extract_strided_slice %117 {offsets = [0, 4, 0], sizes = [2, 16, 8], strides = [1, 1, 1]} : vector<2x20x8xf32> to vector<2x16x8xf32>
    %121 = tpu.concatenate %118, %119, %120 in 2 : vector<2x16x8xf32>, vector<2x16x8xf32>, vector<2x16x8xf32> -> vector<2x16x24xf32>
    %122 = vector.shape_cast %121 : vector<2x16x24xf32> to vector<32x24xf32>
    %123 = arith.truncf %122 : vector<32x24xf32> to vector<32x24xbf16>
    %c3 = arith.constant 3 : index
    %c0_36 = arith.constant 0 : index
    %c0_37 = arith.constant 0 : index
    %124 = vector.load %arg2[%c3, %c0_36, %c0_37] : memref<7x24x8xbf16, #tpu.memory_space<vmem>>, vector<1x24x8xbf16>
    %125 = vector.shape_cast %124 : vector<1x24x8xbf16> to vector<24x8xbf16>
    %cst_38 = arith.constant dense<0.000000e+00> : vector<32x8xf32>
    %126 = tpu.matmul %123, %125, %cst_38 {dimension_numbers = #tpu.dot_dimension_numbers<[1], [0], [0], [1], [0, 0, 1, 1], [], []>} : vector<32x24xbf16>, vector<24x8xbf16>, vector<32x8xf32> -> vector<32x8xf32>
    %127 = vector.extract_strided_slice %2 {offsets = [11, 0], sizes = [1, 8], strides = [1, 1]} : vector<16x128xf32> to vector<1x8xf32>
    %128 = vector.extract_strided_slice %2 {offsets = [11, 8], sizes = [1, 8], strides = [1, 1]} : vector<16x128xf32> to vector<1x8xf32>
    %129 = vector.extract_strided_slice %2 {offsets = [11, 16], sizes = [1, 8], strides = [1, 1]} : vector<16x128xf32> to vector<1x8xf32>
    %130 = vector.broadcast %127 : vector<1x8xf32> to vector<32x8xf32>
    %131 = arith.addf %126, %130 : vector<32x8xf32>
    %cst_39 = arith.constant 0.000000e+00 : f32
    %132 = vector.broadcast %cst_39 : f32 to vector<32x8xf32>
    %133 = arith.maximumf %131, %132 : vector<32x8xf32>
    %134 = vector.broadcast %128 : vector<1x8xf32> to vector<32x8xf32>
    %135 = arith.mulf %133, %134 : vector<32x8xf32>
    %136 = vector.broadcast %129 : vector<1x8xf32> to vector<32x8xf32>
    %137 = arith.addf %135, %136 : vector<32x8xf32>
    %138 = arith.truncf %137 : vector<32x8xf32> to vector<32x8xbf16>
    %c3_40 = arith.constant 3 : index
    %c0_41 = arith.constant 0 : index
    %c0_42 = arith.constant 0 : index
    %139 = vector.load %arg3[%c3_40, %c0_41, %c0_42] : memref<8x8x64xbf16, #tpu.memory_space<vmem>>, vector<1x8x64xbf16>
    %140 = vector.shape_cast %139 : vector<1x8x64xbf16> to vector<8x64xbf16>
    %cst_43 = arith.constant dense<0.000000e+00> : vector<32x64xf32>
    %141 = tpu.matmul %138, %140, %cst_43 {dimension_numbers = #tpu.dot_dimension_numbers<[1], [0], [0], [1], [0, 0, 1, 1], [], []>} : vector<32x8xbf16>, vector<8x64xbf16>, vector<32x64xf32> -> vector<32x64xf32>
    %142 = arith.addf %113, %141 : vector<32x64xf32>
    %143 = vector.shape_cast %137 : vector<32x8xf32> to vector<2x16x8xf32>
    %144 = vector.extract_strided_slice %27 {offsets = [0, 0, 32], sizes = [2, 16, 8], strides = [1, 1, 1]} : vector<2x16x64xf32> to vector<2x16x8xf32>
    %145 = arith.addf %143, %144 : vector<2x16x8xf32>
    %146 = tpu.concatenate %28, %145, %28 in 1 : vector<2x2x8xf32>, vector<2x16x8xf32>, vector<2x2x8xf32> -> vector<2x20x8xf32>
    %147 = vector.extract_strided_slice %146 {offsets = [0, 0, 0], sizes = [2, 16, 8], strides = [1, 1, 1]} : vector<2x20x8xf32> to vector<2x16x8xf32>
    %148 = vector.extract_strided_slice %146 {offsets = [0, 2, 0], sizes = [2, 16, 8], strides = [1, 1, 1]} : vector<2x20x8xf32> to vector<2x16x8xf32>
    %149 = vector.extract_strided_slice %146 {offsets = [0, 4, 0], sizes = [2, 16, 8], strides = [1, 1, 1]} : vector<2x20x8xf32> to vector<2x16x8xf32>
    %150 = tpu.concatenate %147, %148, %149 in 2 : vector<2x16x8xf32>, vector<2x16x8xf32>, vector<2x16x8xf32> -> vector<2x16x24xf32>
    %151 = vector.shape_cast %150 : vector<2x16x24xf32> to vector<32x24xf32>
    %152 = arith.truncf %151 : vector<32x24xf32> to vector<32x24xbf16>
    %c4 = arith.constant 4 : index
    %c0_44 = arith.constant 0 : index
    %c0_45 = arith.constant 0 : index
    %153 = vector.load %arg2[%c4, %c0_44, %c0_45] : memref<7x24x8xbf16, #tpu.memory_space<vmem>>, vector<1x24x8xbf16>
    %154 = vector.shape_cast %153 : vector<1x24x8xbf16> to vector<24x8xbf16>
    %cst_46 = arith.constant dense<0.000000e+00> : vector<32x8xf32>
    %155 = tpu.matmul %152, %154, %cst_46 {dimension_numbers = #tpu.dot_dimension_numbers<[1], [0], [0], [1], [0, 0, 1, 1], [], []>} : vector<32x24xbf16>, vector<24x8xbf16>, vector<32x8xf32> -> vector<32x8xf32>
    %156 = vector.extract_strided_slice %2 {offsets = [12, 0], sizes = [1, 8], strides = [1, 1]} : vector<16x128xf32> to vector<1x8xf32>
    %157 = vector.extract_strided_slice %2 {offsets = [12, 8], sizes = [1, 8], strides = [1, 1]} : vector<16x128xf32> to vector<1x8xf32>
    %158 = vector.extract_strided_slice %2 {offsets = [12, 16], sizes = [1, 8], strides = [1, 1]} : vector<16x128xf32> to vector<1x8xf32>
    %159 = vector.broadcast %156 : vector<1x8xf32> to vector<32x8xf32>
    %160 = arith.addf %155, %159 : vector<32x8xf32>
    %cst_47 = arith.constant 0.000000e+00 : f32
    %161 = vector.broadcast %cst_47 : f32 to vector<32x8xf32>
    %162 = arith.maximumf %160, %161 : vector<32x8xf32>
    %163 = vector.broadcast %157 : vector<1x8xf32> to vector<32x8xf32>
    %164 = arith.mulf %162, %163 : vector<32x8xf32>
    %165 = vector.broadcast %158 : vector<1x8xf32> to vector<32x8xf32>
    %166 = arith.addf %164, %165 : vector<32x8xf32>
    %167 = arith.truncf %166 : vector<32x8xf32> to vector<32x8xbf16>
    %c4_48 = arith.constant 4 : index
    %c0_49 = arith.constant 0 : index
    %c0_50 = arith.constant 0 : index
    %168 = vector.load %arg3[%c4_48, %c0_49, %c0_50] : memref<8x8x64xbf16, #tpu.memory_space<vmem>>, vector<1x8x64xbf16>
    %169 = vector.shape_cast %168 : vector<1x8x64xbf16> to vector<8x64xbf16>
    %cst_51 = arith.constant dense<0.000000e+00> : vector<32x64xf32>
    %170 = tpu.matmul %167, %169, %cst_51 {dimension_numbers = #tpu.dot_dimension_numbers<[1], [0], [0], [1], [0, 0, 1, 1], [], []>} : vector<32x8xbf16>, vector<8x64xbf16>, vector<32x64xf32> -> vector<32x64xf32>
    %171 = arith.addf %142, %170 : vector<32x64xf32>
    %172 = vector.shape_cast %166 : vector<32x8xf32> to vector<2x16x8xf32>
    %173 = vector.extract_strided_slice %27 {offsets = [0, 0, 40], sizes = [2, 16, 8], strides = [1, 1, 1]} : vector<2x16x64xf32> to vector<2x16x8xf32>
    %174 = arith.addf %172, %173 : vector<2x16x8xf32>
    %175 = tpu.concatenate %28, %174, %28 in 1 : vector<2x2x8xf32>, vector<2x16x8xf32>, vector<2x2x8xf32> -> vector<2x20x8xf32>
    %176 = vector.extract_strided_slice %175 {offsets = [0, 0, 0], sizes = [2, 16, 8], strides = [1, 1, 1]} : vector<2x20x8xf32> to vector<2x16x8xf32>
    %177 = vector.extract_strided_slice %175 {offsets = [0, 2, 0], sizes = [2, 16, 8], strides = [1, 1, 1]} : vector<2x20x8xf32> to vector<2x16x8xf32>
    %178 = vector.extract_strided_slice %175 {offsets = [0, 4, 0], sizes = [2, 16, 8], strides = [1, 1, 1]} : vector<2x20x8xf32> to vector<2x16x8xf32>
    %179 = tpu.concatenate %176, %177, %178 in 2 : vector<2x16x8xf32>, vector<2x16x8xf32>, vector<2x16x8xf32> -> vector<2x16x24xf32>
    %180 = vector.shape_cast %179 : vector<2x16x24xf32> to vector<32x24xf32>
    %181 = arith.truncf %180 : vector<32x24xf32> to vector<32x24xbf16>
    %c5 = arith.constant 5 : index
    %c0_52 = arith.constant 0 : index
    %c0_53 = arith.constant 0 : index
    %182 = vector.load %arg2[%c5, %c0_52, %c0_53] : memref<7x24x8xbf16, #tpu.memory_space<vmem>>, vector<1x24x8xbf16>
    %183 = vector.shape_cast %182 : vector<1x24x8xbf16> to vector<24x8xbf16>
    %cst_54 = arith.constant dense<0.000000e+00> : vector<32x8xf32>
    %184 = tpu.matmul %181, %183, %cst_54 {dimension_numbers = #tpu.dot_dimension_numbers<[1], [0], [0], [1], [0, 0, 1, 1], [], []>} : vector<32x24xbf16>, vector<24x8xbf16>, vector<32x8xf32> -> vector<32x8xf32>
    %185 = vector.extract_strided_slice %2 {offsets = [13, 0], sizes = [1, 8], strides = [1, 1]} : vector<16x128xf32> to vector<1x8xf32>
    %186 = vector.extract_strided_slice %2 {offsets = [13, 8], sizes = [1, 8], strides = [1, 1]} : vector<16x128xf32> to vector<1x8xf32>
    %187 = vector.extract_strided_slice %2 {offsets = [13, 16], sizes = [1, 8], strides = [1, 1]} : vector<16x128xf32> to vector<1x8xf32>
    %188 = vector.broadcast %185 : vector<1x8xf32> to vector<32x8xf32>
    %189 = arith.addf %184, %188 : vector<32x8xf32>
    %cst_55 = arith.constant 0.000000e+00 : f32
    %190 = vector.broadcast %cst_55 : f32 to vector<32x8xf32>
    %191 = arith.maximumf %189, %190 : vector<32x8xf32>
    %192 = vector.broadcast %186 : vector<1x8xf32> to vector<32x8xf32>
    %193 = arith.mulf %191, %192 : vector<32x8xf32>
    %194 = vector.broadcast %187 : vector<1x8xf32> to vector<32x8xf32>
    %195 = arith.addf %193, %194 : vector<32x8xf32>
    %196 = arith.truncf %195 : vector<32x8xf32> to vector<32x8xbf16>
    %c5_56 = arith.constant 5 : index
    %c0_57 = arith.constant 0 : index
    %c0_58 = arith.constant 0 : index
    %197 = vector.load %arg3[%c5_56, %c0_57, %c0_58] : memref<8x8x64xbf16, #tpu.memory_space<vmem>>, vector<1x8x64xbf16>
    %198 = vector.shape_cast %197 : vector<1x8x64xbf16> to vector<8x64xbf16>
    %cst_59 = arith.constant dense<0.000000e+00> : vector<32x64xf32>
    %199 = tpu.matmul %196, %198, %cst_59 {dimension_numbers = #tpu.dot_dimension_numbers<[1], [0], [0], [1], [0, 0, 1, 1], [], []>} : vector<32x8xbf16>, vector<8x64xbf16>, vector<32x64xf32> -> vector<32x64xf32>
    %200 = arith.addf %171, %199 : vector<32x64xf32>
    %201 = vector.shape_cast %195 : vector<32x8xf32> to vector<2x16x8xf32>
    %202 = vector.extract_strided_slice %27 {offsets = [0, 0, 48], sizes = [2, 16, 8], strides = [1, 1, 1]} : vector<2x16x64xf32> to vector<2x16x8xf32>
    %203 = arith.addf %201, %202 : vector<2x16x8xf32>
    %204 = tpu.concatenate %28, %203, %28 in 1 : vector<2x2x8xf32>, vector<2x16x8xf32>, vector<2x2x8xf32> -> vector<2x20x8xf32>
    %205 = vector.extract_strided_slice %204 {offsets = [0, 0, 0], sizes = [2, 16, 8], strides = [1, 1, 1]} : vector<2x20x8xf32> to vector<2x16x8xf32>
    %206 = vector.extract_strided_slice %204 {offsets = [0, 2, 0], sizes = [2, 16, 8], strides = [1, 1, 1]} : vector<2x20x8xf32> to vector<2x16x8xf32>
    %207 = vector.extract_strided_slice %204 {offsets = [0, 4, 0], sizes = [2, 16, 8], strides = [1, 1, 1]} : vector<2x20x8xf32> to vector<2x16x8xf32>
    %208 = tpu.concatenate %205, %206, %207 in 2 : vector<2x16x8xf32>, vector<2x16x8xf32>, vector<2x16x8xf32> -> vector<2x16x24xf32>
    %209 = vector.shape_cast %208 : vector<2x16x24xf32> to vector<32x24xf32>
    %210 = arith.truncf %209 : vector<32x24xf32> to vector<32x24xbf16>
    %c6 = arith.constant 6 : index
    %c0_60 = arith.constant 0 : index
    %c0_61 = arith.constant 0 : index
    %211 = vector.load %arg2[%c6, %c0_60, %c0_61] : memref<7x24x8xbf16, #tpu.memory_space<vmem>>, vector<1x24x8xbf16>
    %212 = vector.shape_cast %211 : vector<1x24x8xbf16> to vector<24x8xbf16>
    %cst_62 = arith.constant dense<0.000000e+00> : vector<32x8xf32>
    %213 = tpu.matmul %210, %212, %cst_62 {dimension_numbers = #tpu.dot_dimension_numbers<[1], [0], [0], [1], [0, 0, 1, 1], [], []>} : vector<32x24xbf16>, vector<24x8xbf16>, vector<32x8xf32> -> vector<32x8xf32>
    %214 = vector.extract_strided_slice %2 {offsets = [14, 0], sizes = [1, 8], strides = [1, 1]} : vector<16x128xf32> to vector<1x8xf32>
    %215 = vector.extract_strided_slice %2 {offsets = [14, 8], sizes = [1, 8], strides = [1, 1]} : vector<16x128xf32> to vector<1x8xf32>
    %216 = vector.extract_strided_slice %2 {offsets = [14, 16], sizes = [1, 8], strides = [1, 1]} : vector<16x128xf32> to vector<1x8xf32>
    %217 = vector.broadcast %214 : vector<1x8xf32> to vector<32x8xf32>
    %218 = arith.addf %213, %217 : vector<32x8xf32>
    %cst_63 = arith.constant 0.000000e+00 : f32
    %219 = vector.broadcast %cst_63 : f32 to vector<32x8xf32>
    %220 = arith.maximumf %218, %219 : vector<32x8xf32>
    %221 = vector.broadcast %215 : vector<1x8xf32> to vector<32x8xf32>
    %222 = arith.mulf %220, %221 : vector<32x8xf32>
    %223 = vector.broadcast %216 : vector<1x8xf32> to vector<32x8xf32>
    %224 = arith.addf %222, %223 : vector<32x8xf32>
    %225 = arith.truncf %224 : vector<32x8xf32> to vector<32x8xbf16>
    %c6_64 = arith.constant 6 : index
    %c0_65 = arith.constant 0 : index
    %c0_66 = arith.constant 0 : index
    %226 = vector.load %arg3[%c6_64, %c0_65, %c0_66] : memref<8x8x64xbf16, #tpu.memory_space<vmem>>, vector<1x8x64xbf16>
    %227 = vector.shape_cast %226 : vector<1x8x64xbf16> to vector<8x64xbf16>
    %cst_67 = arith.constant dense<0.000000e+00> : vector<32x64xf32>
    %228 = tpu.matmul %225, %227, %cst_67 {dimension_numbers = #tpu.dot_dimension_numbers<[1], [0], [0], [1], [0, 0, 1, 1], [], []>} : vector<32x8xbf16>, vector<8x64xbf16>, vector<32x64xf32> -> vector<32x64xf32>
    %229 = arith.addf %200, %228 : vector<32x64xf32>
    %230 = vector.broadcast %6 : vector<1x64xf32> to vector<32x64xf32>
    %231 = arith.addf %229, %230 : vector<32x64xf32>
    %cst_68 = arith.constant 0.000000e+00 : f32
    %232 = vector.broadcast %cst_68 : f32 to vector<32x64xf32>
    %233 = arith.maximumf %231, %232 : vector<32x64xf32>
    %234 = vector.broadcast %7 : vector<1x64xf32> to vector<32x64xf32>
    %235 = arith.mulf %233, %234 : vector<32x64xf32>
    %236 = vector.broadcast %8 : vector<1x64xf32> to vector<32x64xf32>
    %237 = arith.addf %235, %236 : vector<32x64xf32>
    %238 = vector.shape_cast %237 : vector<32x64xf32> to vector<2x16x64xf32>
    %cst_69 = arith.constant dense<0.000000e+00> : vector<2x64xf32>
    %239 = vector.multi_reduction <add>, %238, %cst_69 [1] : vector<2x16x64xf32> to vector<2x64xf32>
    %cst_70 = arith.constant 1.600000e+01 : f32
    %240 = vector.broadcast %cst_70 : f32 to vector<2x64xf32>
    %241 = arith.divf %239, %240 : vector<2x64xf32>
    %242 = arith.truncf %241 : vector<2x64xf32> to vector<2x64xbf16>
    %c0_71 = arith.constant 0 : index
    %c0_72 = arith.constant 0 : index
    %243 = vector.load %arg4[%c0_71, %c0_72] : memref<64x128xbf16, #tpu.memory_space<vmem>>, vector<64x128xbf16>
    %cst_73 = arith.constant dense<0.000000e+00> : vector<2x128xf32>
    %244 = tpu.matmul %242, %243, %cst_73 {dimension_numbers = #tpu.dot_dimension_numbers<[1], [0], [0], [1], [0, 0, 1, 1], [], []>} : vector<2x64xbf16>, vector<64x128xbf16>, vector<2x128xf32> -> vector<2x128xf32>
    %245 = vector.broadcast %9 : vector<1x128xf32> to vector<2x128xf32>
    %246 = arith.addf %244, %245 : vector<2x128xf32>
    %cst_74 = arith.constant 0.000000e+00 : f32
    %247 = vector.broadcast %cst_74 : f32 to vector<2x128xf32>
    %248 = arith.maximumf %246, %247 : vector<2x128xf32>
    %249 = arith.truncf %248 : vector<2x128xf32> to vector<2x128xbf16>
    %c0_75 = arith.constant 0 : index
    %c0_76 = arith.constant 0 : index
    %250 = vector.load %arg5[%c0_75, %c0_76] : memref<128x64xbf16, #tpu.memory_space<vmem>>, vector<128x64xbf16>
    %cst_77 = arith.constant dense<0.000000e+00> : vector<2x64xf32>
    %251 = tpu.matmul %249, %250, %cst_77 {dimension_numbers = #tpu.dot_dimension_numbers<[1], [0], [0], [1], [0, 0, 1, 1], [], []>} : vector<2x128xbf16>, vector<128x64xbf16>, vector<2x64xf32> -> vector<2x64xf32>
    %252 = vector.broadcast %10 : vector<1x64xf32> to vector<2x64xf32>
    %253 = arith.addf %251, %252 : vector<2x64xf32>
    %254 = arith.negf %253 : vector<2x64xf32>
    %255 = math.exp %254 : vector<2x64xf32>
    %cst_78 = arith.constant 1.000000e+00 : f32
    %256 = vector.broadcast %cst_78 : f32 to vector<2x64xf32>
    %257 = arith.addf %256, %255 : vector<2x64xf32>
    %258 = arith.divf %256, %257 : vector<2x64xf32>
    %259 = vector.shape_cast %258 : vector<2x64xf32> to vector<2x1x64xf32>
    %260 = vector.broadcast %259 : vector<2x1x64xf32> to vector<2x16x64xf32>
    %261 = arith.mulf %238, %260 : vector<2x16x64xf32>
    %262 = arith.addf %261, %0 : vector<2x16x64xf32>
    %c0_79 = arith.constant 0 : index
    %c0_80 = arith.constant 0 : index
    %c0_81 = arith.constant 0 : index
    %263 = vector.load %arg7[%c0_79, %c0_80, %c0_81] : memref<2x16x64xf32, #tpu.memory_space<vmem>>, vector<2x16x64xf32>
    tpu.vector_store %arg7[%c0_79, %c0_80, %c0_81], %262 {strides = array<i32>} : memref<2x16x64xf32, #tpu.memory_space<vmem>>, vector<2x16x64xf32>,
    return
  }
}

</mosaic_0001>

<bundles_post_ra>
// kernel: tpu_custom_call.1
= control target key start
LH: loop header
LB: loop body
LE: loop exit
PB: predicated region body
PF: predicated region fallthrough
CT: control target
= control target key end

     0   :  { %vm72_vm0 = vcmask 523264   ;;  %s3661_s0 = inlined_call_operand.vmem [shape: f32[2,16,64], index: 0, kind: input, shape index: {}]   ;;  %s3662_s1 = inlined_call_operand.vmem [shape: bf16[64,64], index: 1, kind: input, shape index: {}]   ;;  %s3663_s2 = inlined_call_operand.vmem [shape: bf16[7,24,8], index: 2, kind: input, shape index: {}]   ;;  %s3664_s3 = inlined_call_operand.vmem [shape: bf16[8,8,64], index: 3, kind: input, shape index: {}]   ;;  %s3665_s4 = inlined_call_operand.vmem [shape: bf16[64,128], index: 4, kind: input, shape index: {}]   ;;  %s3666_s5 = inlined_call_operand.vmem [shape: bf16[128,64], index: 5, kind: input, shape index: {}]   ;;  %s3667_s6 = inlined_call_operand.vmem [shape: f32[16,128], index: 6, kind: input, shape index: {}]   ;;  %s3668_s7 = inlined_call_operand.hbm [shape: f32[2,16,64], index: 7, kind: output, shape index: {}]  }
   0x1   :  { %v2798_v0 = vld [vmem:[%s3662_s1] sm:$0xff]   ;;  %v2799_v1 = vld [vmem:[%s3662_s1 + $0x8] sm:$0xff]   ;;  %v2800_v2 = vld [vmem:[%s3662_s1 + $0x10] sm:$0xff]  }
   0x2   :  { %2453 = vmatprep.subr.bf16.mxu0 %v2798_v0  ;;  %v28_v3 = vld [vmem:[%s3661_s0] sm:$0xff]  ;;  %v29_v4 = vld [vmem:[%s3661_s0 + $0x8] sm:$0xff]  ;;  %v2801_v6 = vld [vmem:[%s3662_s1 + $0x18] sm:$0xff]  }
   0x3   :  { %2454 = vmatpush3.bf16.msra.mxu0 %v2798_v0  ;;  %v34_v5 = vpack.c.bf16 %v29_v4, %v28_v3  ;;  %v30_v7 = vld [vmem:[%s3661_s0 + $0x10] sm:$0xff]  ;;  %v31_v8 = vld [vmem:[%s3661_s0 + $0x18] sm:$0xff] }
   0x4   :  { %2455 = vmatprep.subr.bf16.mxu0 %v2799_v1  ;;  %v35_v9 = vpack.c.bf16 %v31_v8, %v30_v7 }
   0x5   :  { %2461 = vmatprep.mubr.msk.bf16.mxu0 %vm72_vm0, %v34_v5 }
   0x7   :  { %2456 = vmatpush3.bf16.msra.mxu0 %v2799_v1 }
   0x8   :  { %2457 = vmatprep.subr.bf16.mxu0 %v2800_v2 }
   0xb   :  { %2458 = vmatpush3.bf16.msra.mxu0 %v2800_v2 }
   0xc   :  { %2459 = vmatprep.subr.bf16.mxu0 %v2801_v6 }
   0xf   :  { %2460 = vmatpush3.bf16.msra.mxu0 %v2801_v6 }
  0x12   :  { %2462 = vmatmul.mubr.msk.bf16.vlgmr.msra.gmra.mrb[0].mxu0 %vm72_vm0, %v35_v9 }
  0x13   :  { %12 = vsyncpa [#allocation3], 0  ;;  %v44_v10 = vlaneseq  ;;  %v32_v13 = vld [vmem:[%s3667_s6] sm:$0xff]  ;;  %vm156_vm1 = vcmask 1041408   ;;  %vm200_vm2 = vcmask 1043456   ;;  %vm177_vm3 = vcmask 1045504  }
  0x14   :  { %v2802_v39 = vld [vmem:[%s3663_s2] sm:$0xff]   ;;  %v2803_v54 = vld [vmem:[%s3663_s2 + $0x8] ss:$0 sps:$4 sm:$0xff]   ;;  %s2862_s22 = smov 16   ;;  %s2863_s23 = smov 8   ;;  %vm223_vm4 = vcmask 64512  }
  0x15   :  { %v2942_v11 = vshrl.u32 %v44_v10, 7  ;;  %2465 = vmatprep.subr.bf16.mxu0 %v2802_v39  ;;  %v259_v9 = vsel %vm200_vm2, %v2803_v54, 0  ;;  %v3004_v10 = vld [vmem:[%s3667_s6 + $0x8] sm:$0xff]  ;;  %s2864_s26 = smov 112   ;;  %s2865_s27 = smov 120   ;;  %vm228_vm5 = vcmask 130048  }
  0x16   :  { %2466 = vmatpush3.bf16.msra.mxu0 %v2802_v39  ;;  %vm251_vm6 = vcmask 195584   ;;  %s2866_s15 = smov 104   ;;  %s2867_s19 = smov 96   ;;  %vm2872_vm7 = vmmov 0   ;;  %vm2045_vm8 = vcmask 1041409  }
  0x17   :  { %v2945_v12 = vsub.s32 0, %v2942_v11  ;;  %v134_v15 = vsub.s32 1, %v2942_v11  ;;  %v142_v16 = vsub.s32 2, %v2942_v11  ;;  %2629 = vmatprep.subr.msk.bf16.mxu0 %vm200_vm2, %v2803_v54  ;;  %s2868_s28 = smov 88   ;;  %s2869_s12 = smov 80  }
  0x19   :  { %v47_v14 = vrot.slane %v32_v13, %v2945_v12  ;;  %v135_v19 = vrot.slane %v32_v13, %v134_v15  ;;  %v143_v24 = vrot.slane %v32_v13, %v142_v16 }
  0x1a   :  { %2468 = vmatpush3.bf16.msra.mxu0 %v259_v9 }
  0xe5   :  { %v2463_v17 = vpop.f32.mrb[0].mxu0 }
  0xe6   :  { %v122_v18 = vadd.f32 %v2463_v17, %v47_v14  ;;  %v113_v20 = vpop.f32.mrb[1].mxu0  ;;  %v241_v17 = vrot.slane %v3004_v10, %v2945_v12 }
  0xe7   :  { %v114_v21 = vadd.f32 %v113_v20, %v47_v14  ;;  %v2464_v22 = vpop.f32.mrb[2].mxu0 }
  0xe8   :  { %v130_v23 = vmax.f32 %v122_v18, 0.0  ;;  %v125_v25 = vadd.f32 %v2464_v22, %v47_v14  ;;  %v116_v26 = vpop.f32.mrb[3].mxu0 }
  0xe9   :  { %v128_v27 = vmax.f32 %v114_v21, 0.0  ;;  %v117_v28 = vadd.f32 %v116_v26, %v47_v14 }
  0xea   :  { %v138_v29 = vmul.f32 %v135_v19, %v130_v23  ;;  %v131_v30 = vmax.f32 %v125_v25, 0.0 }
  0xeb   :  { %v136_v31 = vmul.f32 %v135_v19, %v128_v27  ;;  %v129_v32 = vmax.f32 %v117_v28, 0.0 }
  0xec   :  { %v2957_v33 = vadd.f32 %v143_v24, %v138_v29  ;;  %v139_v34 = vmul.f32 %v135_v19, %v131_v30 }
  0xed   :  { %v2959_v35 = vadd.f32 %v143_v24, %v136_v31  ;;  %v137_v36 = vmul.f32 %v135_v19, %v129_v32 }
  0xee   :  { %v2961_v37 = vadd.f32 %v143_v24, %v139_v34  ;;  %v160_v38 = vrot.slane %v2957_v33, 6 }
  0xef   :  { %v2967_v40 = vadd.f32 %v143_v24, %v137_v36  ;;  %v157_v41 = vrot.slane %v2959_v35, 6 }
  0xf0   :  { %v161_v42 = vrot.slane %v2961_v37, 6  ;;  %v2974_v45 = vsel %vm156_vm1, 0.0, %v160_v38 }
  0xf1   :  { %v158_v43 = vrot.slane %v2967_v40, 6  ;;  %v169_v44 = vsel %vm156_vm1, 0.0, %v157_v41  ;;  %v206_v59 = vrot.slane %v2974_v45, 4  ;;  %v183_v60 = vrot.slane %v2974_v45, 2 }
  0xf2   :  { %v201_v46 = vrot.slane %v169_v44, 4  ;;  %v178_v47 = vrot.slane %v169_v44, 2  ;;  %v2977_v48 = vsel %vm156_vm1, %v160_v38, %v161_v42  ;;  %v172_v49 = vsel %vm156_vm1, %v161_v42, 0.0 }
  0xf3   :  { %v159_v50 = vsel %vm156_vm1, %v157_v41, %v158_v43  ;;  %v171_v51 = vsel %vm156_vm1, %v158_v43, 0.0  ;;  %v207_v52 = vrot.slane %v2977_v48, 4  ;;  %v209_v53 = vrot.slane %v172_v49, 4 }
  0xf4   :  { %v202_v55 = vrot.slane %v159_v50, 4  ;;  %v204_v56 = vrot.slane %v171_v51, 4  ;;  %v179_v57 = vrot.slane %v159_v50, 2  ;;  %v181_v58 = vrot.slane %v171_v51, 2 }
  0xf5   :  { %v184_v61 = vrot.slane %v2977_v48, 2  ;;  %v186_v62 = vrot.slane %v172_v49, 2  ;;  %v208_v5 = vsel %vm200_vm2, %v206_v59, %v207_v52  ;;  %v210_v6 = vsel %vm200_vm2, %v207_v52, %v209_v53 }
  0xf6   :  { %v203_v63 = vsel %vm200_vm2, %v201_v46, %v202_v55  ;;  %v205_v0 = vsel %vm200_vm2, %v202_v55, %v204_v56  ;;  %v180_v1 = vsel %vm177_vm3, %v178_v47, %v179_v57  ;;  %v182_v2 = vsel %vm177_vm3, %v179_v57, %v181_v58 }
  0xf7   :  { %v2668_v3 = vpack.i.bf16 %v205_v0, %v203_v63  ;;  %v2658_v4 = vpack.i.bf16 %v182_v2, %v180_v1  ;;  %v185_v7 = vsel %vm177_vm3, %v183_v60, %v184_v61  ;;  %v187_v8 = vsel %vm177_vm3, %v184_v61, %v186_v62 }
  0xf8   :  { %v2673_v13 = vpack.i.bf16 %v210_v6, %v208_v5  ;;  %v2663_v14 = vpack.i.bf16 %v187_v8, %v185_v7 }
  0xf9   :  { %2669 = vrot.lane.b32.xlu1 %v2668_v3, %s2862_s22  ;;  %2659 = vrot.lane.b32.xlu0 %v2658_v4, %s2863_s23 }
  0xfd   :  { %2674 = vrot.lane.b32.xlu1 %v2673_v13, %s2862_s22  ;;  %2664 = vrot.lane.b32.xlu0 %v2663_v14, %s2863_s23 }
 0x101   :  { %322 = vrot.lane.b32.xlu1 %v241_v17, %s2864_s26  ;;  %315 = vrot.lane.b32.xlu0 %v241_v17, %s2865_s27 }
 0x105   :  { %456 = vrot.lane.b32.xlu1 %v2967_v40, %s2865_s27  ;;  %454 = vrot.lane.b32.xlu0 %v2959_v35, %s2865_s27 }
 0x109   :  { %460 = vrot.lane.b32.xlu1 %v2961_v37, %s2865_s27  ;;  %458 = vrot.lane.b32.xlu0 %v2957_v33, %s2865_s27 }
 0x16b   :  { %v2670_v18 = vpop.permute.xlu1 %2669  ;;  %v2660_v19 = vpop.permute.xlu0 %2659 }
 0x16c   :  { %v2672_v20 = vunpack.i.h.bf16 %v2670_v18  ;;  %v2671_v21 = vunpack.i.l.bf16 %v2670_v18  ;;  %v2662_v22 = vunpack.i.h.bf16 %v2660_v19  ;;  %v2661_v23 = vunpack.i.l.bf16 %v2660_v19 }
 0x16e   :  { %v225_v24 = vsel %vm223_vm4, %v159_v50, %v2662_v22  ;;  %v224_v25 = vsel %vm223_vm4, %v169_v44, %v2661_v23  ;;  %v331_v44 = vld [vmem:[%s3664_s3] sm:$0xf] }
 0x16f   :  { %v2675_v26 = vpop.permute.xlu1 %2674  ;;  %v2665_v27 = vpop.permute.xlu0 %2664  ;;  %v229_v28 = vsel %vm228_vm5, %v224_v25, %v2671_v21  ;;  %v230_v29 = vsel %vm228_vm5, %v225_v24, %v2672_v20  ;;  %2630 = vmatprep.subr.msk.bf16.mxu1 %vm200_vm2, %v331_v44  ;;  %v339_v46 = vsel %vm200_vm2, %v331_v44, 0 }
 0x170   :  { %v2677_v30 = vunpack.i.h.bf16 %v2675_v26  ;;  %v2676_v31 = vunpack.i.l.bf16 %v2675_v26  ;;  %v2667_v32 = vunpack.i.h.bf16 %v2665_v27  ;;  %v2666_v34 = vunpack.i.l.bf16 %v2665_v27  ;;  %2474 = vmatpush3.bf16.msra.mxu1 %v339_v46 }
 0x171   :  { %v233_v36 = vpack.c.bf16 %v230_v29, %v229_v28 }
 0x172   :  { %v227_v38 = vsel %vm223_vm4, %v2977_v48, %v2667_v32  ;;  %v226_v39 = vsel %vm223_vm4, %v2974_v45, %v2666_v34 }
 0x173   :  { %v232_v41 = vsel %vm228_vm5, %v227_v38, %v2677_v30  ;;  %v231_v42 = vsel %vm228_vm5, %v226_v39, %v2676_v31  ;;  %2469 = vmatprep.mubr.msk.bf16.mxu0 %vm251_vm6, %v233_v36  ;;  %v316_v47 = vpop.permute.xlu0 %315  ;;  %v323_v45 = vpop.permute.xlu1 %322  ;;  %v2805_v38 = vld [vmem:[%s3663_s2 + $0x14] ss:$0 sps:$4 sm:$0xff]  }
 0x174   :  { %v234_v43 = vpack.c.bf16 %v232_v41, %v231_v42 }
 0x176   :  { %2470 = vmatmul.mubr.msk.bf16.vlgmr.msra.gmra.mrb[4].mxu0 %vm251_vm6, %v234_v43 }
 0x177   :  { %v455_v51 = vpop.permute.xlu0 %454  ;;  %v457_v57 = vpop.permute.xlu1 %456 }
 0x17b   :  { %v459_v2 = vpop.permute.xlu0 %458  ;;  %v461_v7 = vpop.permute.xlu1 %460 }
 0x249   :  { %v2471_v48 = vpop.f32.mrb[4].mxu0 }
 0x24a   :  { %v304_v49 = vadd.f32 %v2471_v48, %v241_v17  ;;  %v295_v50 = vpop.f32.mrb[5].mxu0 }
 0x24b   :  { %v296_v52 = vadd.f32 %v295_v50, %v241_v17  ;;  %v2472_v53 = vpop.f32.mrb[6].mxu0 }
 0x24c   :  { %v312_v54 = vmax.f32 %v304_v49, 0.0  ;;  %v307_v55 = vadd.f32 %v2472_v53, %v241_v17  ;;  %v298_v56 = vpop.f32.mrb[7].mxu0 }
 0x24d   :  { %v310_v58 = vmax.f32 %v296_v52, 0.0  ;;  %v299_v59 = vadd.f32 %v298_v56, %v241_v17  ;;  %v2804_v17 = vld [vmem:[%s3663_s2 + $0xc] sm:$0xff]  }
 0x24e   :  { %v320_v60 = vmul.f32 %v316_v47, %v312_v54  ;;  %v313_v61 = vmax.f32 %v307_v55, 0.0  ;;  %2485 = vmatprep.subr.bf16.mxu0 %v2804_v17 }
 0x24f   :  { %v318_v62 = vmul.f32 %v316_v47, %v310_v58  ;;  %v311_v63 = vmax.f32 %v299_v59, 0.0  ;;  %2486 = vmatpush3.bf16.msra.mxu0 %v2804_v17 }
 0x250   :  { %v327_v0 = vadd.f32 %v323_v45, %v320_v60  ;;  %v321_v1 = vmul.f32 %v316_v47, %v313_v61  ;;  %2632 = vmatprep.subr.msk.bf16.mxu0 %vm200_vm2, %v2805_v38  ;;  %v555_v60 = vrot.slane %v3004_v10, %v134_v15 }
 0x251   :  { %v319_v3 = vmul.f32 %v316_v47, %v311_v63  ;;  %v325_v4 = vadd.f32 %v323_v45, %v318_v62 }
 0x252   :  { %v468_v5 = vadd.f32 %v459_v2, %v327_v0  ;;  %v328_v6 = vadd.f32 %v323_v45, %v321_v1 }
 0x253   :  { %v326_v8 = vadd.f32 %v323_v45, %v319_v3  ;;  %v466_v9 = vadd.f32 %v455_v51, %v325_v4 }
 0x254   :  { %v477_v13 = vrot.slane %v468_v5, 6  ;;  %v330_v14 = vpack.c.bf16 %v328_v6, %v327_v0  ;;  %v469_v18 = vadd.f32 %v461_v7, %v328_v6 }
 0x255   :  { %v329_v19 = vpack.c.bf16 %v326_v8, %v325_v4  ;;  %v467_v20 = vadd.f32 %v457_v57, %v326_v8  ;;  %v474_v21 = vrot.slane %v466_v9, 6  ;;  %v572_v57 = vsel %vm200_vm2, %v2805_v38, 0 }
 0x256   :  { %v3041_v22 = vsel %vm156_vm1, 0.0, %v477_v13  ;;  %v478_v23 = vrot.slane %v469_v18, 6  ;;  %2488 = vmatpush3.bf16.msra.mxu0 %v572_v57 }
 0x257   :  { %2475 = vmatprep.mubr.msk.bf16.mxu1 %vm223_vm4, %v329_v19  ;;  %v475_v24 = vrot.slane %v467_v20, 6  ;;  %v486_v25 = vsel %vm156_vm1, 0.0, %v474_v21  ;;  %v499_v26 = vrot.slane %v3041_v22, 2  ;;  %v521_v30 = vrot.slane %v3041_v22, 4 }
 0x258   :  { %v489_v27 = vsel %vm156_vm1, %v478_v23, 0.0  ;;  %2476 = vmatmul.mubr.msk.bf16.vlgmr.msra.gmra.mrb[0].mxu1 %vm223_vm4, %v330_v14  ;;  %v479_v28 = vsel %vm156_vm1, %v477_v13, %v478_v23  ;;  %v494_v29 = vrot.slane %v486_v25, 2  ;;  %v516_v51 = vrot.slane %v486_v25, 4 }
 0x259   :  { %v476_v31 = vsel %vm156_vm1, %v474_v21, %v475_v24  ;;  %v488_v32 = vsel %vm156_vm1, %v475_v24, 0.0  ;;  %v500_v34 = vrot.slane %v479_v28, 2  ;;  %v502_v36 = vrot.slane %v489_v27, 2 }
 0x25a   :  { %v497_v39 = vrot.slane %v488_v32, 2  ;;  %v519_v41 = vrot.slane %v488_v32, 4  ;;  %v495_v42 = vrot.slane %v476_v31, 2  ;;  %v522_v43 = vrot.slane %v479_v28, 4 }
 0x25b   :  { %v501_v44 = vsel %vm177_vm3, %v499_v26, %v500_v34  ;;  %v503_v46 = vsel %vm177_vm3, %v500_v34, %v502_v36  ;;  %v524_v47 = vrot.slane %v489_v27, 4  ;;  %v517_v45 = vrot.slane %v476_v31, 4 }
 0x25c   :  { %v2678_v48 = vpack.i.bf16 %v503_v46, %v501_v44  ;;  %v496_v49 = vsel %vm177_vm3, %v494_v29, %v495_v42  ;;  %v498_v50 = vsel %vm177_vm3, %v495_v42, %v497_v39  ;;  %v523_v53 = vsel %vm200_vm2, %v521_v30, %v522_v43 }
 0x25d   :  { %v2683_v52 = vpack.i.bf16 %v498_v50, %v496_v49  ;;  %v525_v54 = vsel %vm200_vm2, %v522_v43, %v524_v47  ;;  %v518_v55 = vsel %vm200_vm2, %v516_v51, %v517_v45  ;;  %v520_v56 = vsel %vm200_vm2, %v517_v45, %v519_v41 }
 0x25e   :  { %2679 = vrot.lane.b32.xlu1 %v2678_v48, %s2863_s23  ;;  %v2693_v58 = vpack.i.bf16 %v525_v54, %v523_v53  ;;  %v2688_v59 = vpack.i.bf16 %v520_v56, %v518_v55 }
 0x25f   :  { %2684 = vrot.lane.b32.xlu0 %v2683_v52, %s2863_s23 }
 0x262   :  { %2694 = vrot.lane.b32.xlu1 %v2693_v58, %s2862_s22  ;;  %v2806_v58 = vld [vmem:[%s3663_s2 + $0x18] sm:$0xff]  }
 0x263   :  { %2689 = vrot.lane.b32.xlu0 %v2688_v59, %s2862_s22  ;;  %2499 = vmatprep.subr.bf16.mxu0 %v2806_v58 }
 0x266   :  { %635 = vrot.lane.b32.xlu1 %v555_v60, %s2864_s26 }
 0x267   :  { %628 = vrot.lane.b32.xlu0 %v555_v60, %s2865_s27 }
 0x26a   :  { %710 = vrot.lane.b32.xlu1 %v2967_v40, %s2864_s26 }
 0x26b   :  { %708 = vrot.lane.b32.xlu0 %v2959_v35, %s2864_s26 }
 0x26e   :  { %714 = vrot.lane.b32.xlu1 %v2961_v37, %s2864_s26 }
 0x26f   :  { %712 = vrot.lane.b32.xlu0 %v2957_v33, %s2864_s26 }
 0x2d0   :  { %v2680_v15 = vpop.permute.xlu1 %2679 }
 0x2d1   :  { %v2685_v61 = vpop.permute.xlu0 %2684  ;;  %v2682_v62 = vunpack.i.h.bf16 %v2680_v15  ;;  %v2681_v63 = vunpack.i.l.bf16 %v2680_v15 }
 0x2d2   :  { %v2687_v0 = vunpack.i.h.bf16 %v2685_v61  ;;  %v2686_v1 = vunpack.i.l.bf16 %v2685_v61 }
 0x2d3   :  { %v541_v6 = vsel %vm223_vm4, %v479_v28, %v2682_v62  ;;  %v540_v7 = vsel %vm223_vm4, %v3041_v22, %v2681_v63 }
 0x2d4   :  { %v2695_v2 = vpop.permute.xlu1 %2694  ;;  %v539_v13 = vsel %vm223_vm4, %v476_v31, %v2687_v0  ;;  %v538_v14 = vsel %vm223_vm4, %v486_v25, %v2686_v1 }
 0x2d5   :  { %v2697_v3 = vunpack.i.h.bf16 %v2695_v2  ;;  %v2696_v4 = vunpack.i.l.bf16 %v2695_v2  ;;  %v2690_v5 = vpop.permute.xlu0 %2689 }
 0x2d6   :  { %v2692_v8 = vunpack.i.h.bf16 %v2690_v5  ;;  %v2691_v9 = vunpack.i.l.bf16 %v2690_v5 }
 0x2d7   :  { %v544_v18 = vsel %vm228_vm5, %v540_v7, %v2696_v4  ;;  %v545_v17 = vsel %vm228_vm5, %v541_v6, %v2697_v3 }
 0x2d8   :  { %v542_v19 = vsel %vm228_vm5, %v538_v14, %v2691_v9  ;;  %v543_v20 = vsel %vm228_vm5, %v539_v13, %v2692_v8  ;;  %v547_v23 = vpack.c.bf16 %v545_v17, %v544_v18  ;;  %v636_v24 = vpop.permute.xlu1 %635  ;;  %v2807_v13 = vld [vmem:[%s3663_s2 + $0x20] ss:$0 sps:$4 sm:$0xff]  }
 0x2d9   :  { %v546_v21 = vpack.c.bf16 %v543_v20, %v542_v19  ;;  %v629_v22 = vpop.permute.xlu0 %628 }
 0x2db   :  { %2489 = vmatprep.mubr.msk.bf16.mxu0 %vm251_vm6, %v546_v21 }
 0x2dc   :  { %2490 = vmatmul.mubr.msk.bf16.vlgmr.msra.gmra.mrb[8].mxu0 %vm251_vm6, %v547_v23  ;;  %v711_v36 = vpop.permute.xlu1 %710 }
 0x2dd   :  { %v709_v25 = vpop.permute.xlu0 %708  ;;  %2500 = vmatpush3.bf16.msra.mxu0 %v2806_v58 }
 0x2de   :  { %2634 = vmatprep.subr.msk.bf16.mxu0 %vm200_vm2, %v2807_v13 }
 0x2e0   :  { %v715_v52 = vpop.permute.xlu1 %714 }
 0x2e1   :  { %v713_v45 = vpop.permute.xlu0 %712 }
 0x3af   :  { %v2491_v26 = vpop.f32.mrb[8].mxu0 }
 0x3b0   :  { %v617_v27 = vadd.f32 %v2491_v26, %v555_v60  ;;  %v608_v28 = vpop.f32.mrb[9].mxu0 }
 0x3b1   :  { %v609_v29 = vadd.f32 %v608_v28, %v555_v60  ;;  %v2492_v30 = vpop.f32.mrb[10].mxu0 }
 0x3b2   :  { %v625_v31 = vmax.f32 %v617_v27, 0.0  ;;  %v620_v32 = vadd.f32 %v2492_v30, %v555_v60  ;;  %v611_v34 = vpop.f32.mrb[11].mxu0 }
 0x3b3   :  { %v623_v38 = vmax.f32 %v609_v29, 0.0  ;;  %v612_v39 = vadd.f32 %v611_v34, %v555_v60  ;;  %v826_v34 = vsel %vm200_vm2, %v2807_v13, 0 }
 0x3b4   :  { %v633_v41 = vmul.f32 %v629_v22, %v625_v31  ;;  %v626_v42 = vmax.f32 %v620_v32, 0.0  ;;  %2502 = vmatpush3.bf16.msra.mxu0 %v826_v34 }
 0x3b5   :  { %v631_v43 = vmul.f32 %v629_v22, %v623_v38  ;;  %v624_v44 = vmax.f32 %v612_v39, 0.0  ;;  %v809_v39 = vrot.slane %v3004_v10, %v142_v16 }
 0x3b6   :  { %v3093_v46 = vadd.f32 %v636_v24, %v633_v41  ;;  %v634_v47 = vmul.f32 %v629_v22, %v626_v42 }
 0x3b7   :  { %v3095_v48 = vadd.f32 %v636_v24, %v631_v43  ;;  %v632_v49 = vmul.f32 %v629_v22, %v624_v44 }
 0x3b8   :  { %v722_v50 = vadd.f32 %v713_v45, %v3093_v46  ;;  %v3098_v51 = vadd.f32 %v636_v24, %v634_v47 }
 0x3b9   :  { %v720_v53 = vadd.f32 %v709_v25, %v3095_v48  ;;  %v3101_v54 = vadd.f32 %v636_v24, %v632_v49 }
 0x3ba   :  { %v731_v55 = vrot.slane %v722_v50, 6  ;;  %v643_v56 = vpack.c.bf16 %v3098_v51, %v3093_v46  ;;  %v723_v57 = vadd.f32 %v715_v52, %v3098_v51  ;;  %v2354_v51 = vld [vmem:[%s3664_s3 + $0x14] sm:$0xf] }
 0x3bb   :  { %v728_v59 = vrot.slane %v720_v53, 6  ;;  %v642_v60 = vpack.c.bf16 %v3101_v54, %v3095_v48  ;;  %v721_v15 = vadd.f32 %v711_v36, %v3101_v54  ;;  %v2344_v54 = vld [vmem:[%s3664_s3 + $0x10] sm:$0xf] }
 0x3bc   :  { %v741_v61 = vsel %vm156_vm1, 0.0, %v731_v55  ;;  %v732_v62 = vrot.slane %v723_v57, 6  ;;  %v1415_v46 = vsel %vm200_vm2, %v2344_v54, 0 }
 0x3bd   :  { %v3114_v63 = vsel %vm156_vm1, 0.0, %v728_v59  ;;  %v729_v0 = vrot.slane %v721_v15, 6  ;;  %v753_v1 = vrot.slane %v741_v61, 2  ;;  %v775_v5 = vrot.slane %v741_v61, 4 }
 0x3be   :  { %v743_v2 = vsel %vm156_vm1, %v732_v62, 0.0  ;;  %v733_v3 = vsel %vm156_vm1, %v731_v55, %v732_v62  ;;  %v748_v4 = vrot.slane %v3114_v63, 2  ;;  %v770_v28 = vrot.slane %v3114_v63, 4 }
 0x3bf   :  { %v742_v6 = vsel %vm156_vm1, %v729_v0, 0.0  ;;  %v754_v7 = vrot.slane %v733_v3, 2  ;;  %v756_v8 = vrot.slane %v743_v2, 2  ;;  %v730_v9 = vsel %vm156_vm1, %v728_v59, %v729_v0 }
 0x3c0   :  { %v749_v14 = vrot.slane %v730_v9, 2  ;;  %v751_v18 = vrot.slane %v742_v6, 2  ;;  %v776_v17 = vrot.slane %v733_v3, 4  ;;  %v778_v19 = vrot.slane %v743_v2, 4 }
 0x3c1   :  { %v755_v20 = vsel %vm177_vm3, %v753_v1, %v754_v7  ;;  %v757_v21 = vsel %vm177_vm3, %v754_v7, %v756_v8  ;;  %v771_v23 = vrot.slane %v730_v9, 4  ;;  %v773_v22 = vrot.slane %v742_v6, 4 }
 0x3c2   :  { %v2698_v24 = vpack.i.bf16 %v757_v21, %v755_v20  ;;  %v750_v26 = vsel %vm177_vm3, %v748_v4, %v749_v14  ;;  %v752_v27 = vsel %vm177_vm3, %v749_v14, %v751_v18  ;;  %v777_v29 = vsel %vm200_vm2, %v775_v5, %v776_v17 }
 0x3c3   :  { %v2703_v25 = vpack.i.bf16 %v752_v27, %v750_v26  ;;  %v779_v30 = vsel %vm200_vm2, %v776_v17, %v778_v19  ;;  %v772_v31 = vsel %vm200_vm2, %v770_v28, %v771_v23  ;;  %v774_v32 = vsel %vm200_vm2, %v771_v23, %v773_v22 }
 0x3c4   :  { %2699 = vrot.lane.b32.xlu1 %v2698_v24, %s2863_s23  ;;  %v2713_v36 = vpack.i.bf16 %v779_v30, %v777_v29  ;;  %v2708_v38 = vpack.i.bf16 %v774_v32, %v772_v31 }
 0x3c5   :  { %2704 = vrot.lane.b32.xlu0 %v2703_v25, %s2863_s23 }
 0x3c8   :  { %2714 = vrot.lane.b32.xlu1 %v2713_v36, %s2862_s22 }
 0x3c9   :  { %2709 = vrot.lane.b32.xlu0 %v2708_v38, %s2862_s22 }
 0x3cc   :  { %889 = vrot.lane.b32.xlu1 %v809_v39, %s2864_s26 }
 0x3cd   :  { %882 = vrot.lane.b32.xlu0 %v809_v39, %s2865_s27 }
 0x3d0   :  { %964 = vrot.lane.b32.xlu1 %v2967_v40, %s2866_s15 }
 0x3d1   :  { %962 = vrot.lane.b32.xlu0 %v2959_v35, %s2866_s15 }
 0x3d4   :  { %968 = vrot.lane.b32.xlu1 %v2961_v37, %s2866_s15 }
 0x3d5   :  { %966 = vrot.lane.b32.xlu0 %v2957_v33, %s2866_s15 }
 0x436   :  { %v2700_v41 = vpop.permute.xlu1 %2699 }
 0x437   :  { %v2705_v42 = vpop.permute.xlu0 %2704  ;;  %v2702_v16 = vunpack.i.h.bf16 %v2700_v41  ;;  %v2701_v43 = vunpack.i.l.bf16 %v2700_v41 }
 0x438   :  { %v2707_v44 = vunpack.i.h.bf16 %v2705_v42  ;;  %v2706_v47 = vunpack.i.l.bf16 %v2705_v42 }
 0x439   :  { %v795_v53 = vsel %vm223_vm4, %v733_v3, %v2702_v16  ;;  %v794_v55 = vsel %vm223_vm4, %v741_v61, %v2701_v43  ;;  %v2808_v16 = vld [vmem:[%s3663_s2 + $0x24] sm:$0xff]  }
 0x43a   :  { %v2715_v45 = vpop.permute.xlu1 %2714  ;;  %v793_v59 = vsel %vm223_vm4, %v730_v9, %v2707_v44  ;;  %v792_v15 = vsel %vm223_vm4, %v3114_v63, %v2706_v47  ;;  %2513 = vmatprep.subr.bf16.mxu0 %v2808_v16 }
 0x43b   :  { %v2717_v49 = vunpack.i.h.bf16 %v2715_v45  ;;  %v2716_v50 = vunpack.i.l.bf16 %v2715_v45  ;;  %v2710_v52 = vpop.permute.xlu0 %2709 }
 0x43c   :  { %v2712_v57 = vunpack.i.h.bf16 %v2710_v52  ;;  %v2711_v58 = vunpack.i.l.bf16 %v2710_v52 }
 0x43d   :  { %v798_v62 = vsel %vm228_vm5, %v794_v55, %v2716_v50  ;;  %v799_v0 = vsel %vm228_vm5, %v795_v53, %v2717_v49 }
 0x43e   :  { %v796_v1 = vsel %vm228_vm5, %v792_v15, %v2711_v58  ;;  %v797_v2 = vsel %vm228_vm5, %v793_v59, %v2712_v57  ;;  %v801_v5 = vpack.c.bf16 %v799_v0, %v798_v62  ;;  %v890_v3 = vpop.permute.xlu1 %889 }
 0x43f   :  { %v800_v4 = vpack.c.bf16 %v797_v2, %v796_v1  ;;  %v883_v61 = vpop.permute.xlu0 %882  ;;  %v2809_v2 = vld [vmem:[%s3663_s2 + $0x2c] ss:$0 sps:$4 sm:$0xff]  }
 0x441   :  { %2503 = vmatprep.mubr.msk.bf16.mxu0 %vm251_vm6, %v800_v4 }
 0x442   :  { %2504 = vmatmul.mubr.msk.bf16.vlgmr.msra.gmra.mrb[12].mxu0 %vm251_vm6, %v801_v5  ;;  %v965_v19 = vpop.permute.xlu1 %964 }
 0x443   :  { %v963_v63 = vpop.permute.xlu0 %962  ;;  %2514 = vmatpush3.bf16.msra.mxu0 %v2808_v16 }
 0x444   :  { %2636 = vmatprep.subr.msk.bf16.mxu0 %vm200_vm2, %v2809_v2 }
 0x446   :  { %v969_v34 = vpop.permute.xlu1 %968 }
 0x447   :  { %v967_v25 = vpop.permute.xlu0 %966 }
 0x515   :  { %v2505_v6 = vpop.f32.mrb[12].mxu0 }
 0x516   :  { %v871_v7 = vadd.f32 %v2505_v6, %v809_v39  ;;  %v862_v8 = vpop.f32.mrb[13].mxu0 }
 0x517   :  { %v863_v9 = vadd.f32 %v862_v8, %v809_v39  ;;  %v2506_v13 = vpop.f32.mrb[14].mxu0 }
 0x518   :  { %v879_v14 = vmax.f32 %v871_v7, 0.0  ;;  %v874_v18 = vadd.f32 %v2506_v13, %v809_v39  ;;  %v865_v17 = vpop.f32.mrb[15].mxu0 }
 0x519   :  { %v877_v20 = vmax.f32 %v863_v9, 0.0  ;;  %v866_v21 = vadd.f32 %v865_v17, %v809_v39 }
 0x51a   :  { %v887_v23 = vmul.f32 %v883_v61, %v879_v14  ;;  %v880_v22 = vmax.f32 %v874_v18, 0.0 }
 0x51b   :  { %v885_v24 = vmul.f32 %v883_v61, %v877_v20  ;;  %v878_v26 = vmax.f32 %v866_v21, 0.0 }
 0x51c   :  { %v3159_v27 = vadd.f32 %v890_v3, %v887_v23  ;;  %v888_v28 = vmul.f32 %v883_v61, %v880_v22  ;;  %v3671_v22 = vsub.s32 3, %v2942_v11 }
 0x51d   :  { %v3161_v29 = vadd.f32 %v890_v3, %v885_v24  ;;  %v886_v30 = vmul.f32 %v883_v61, %v878_v26  ;;  %v1080_v24 = vsel %vm200_vm2, %v2809_v2, 0 }
 0x51e   :  { %v976_v31 = vadd.f32 %v967_v25, %v3159_v27  ;;  %v3164_v32 = vadd.f32 %v890_v3, %v888_v28  ;;  %2516 = vmatpush3.bf16.msra.mxu0 %v1080_v24  ;;  %v1063_v25 = vrot.slane %v3004_v10, %v3671_v22 }
 0x51f   :  { %v974_v36 = vadd.f32 %v963_v63, %v3161_v29  ;;  %v3167_v38 = vadd.f32 %v890_v3, %v886_v30 }
 0x520   :  { %v985_v39 = vrot.slane %v976_v31, 6  ;;  %v897_v41 = vpack.c.bf16 %v3164_v32, %v3159_v27  ;;  %v977_v42 = vadd.f32 %v969_v34, %v3164_v32 }
 0x521   :  { %v982_v43 = vrot.slane %v974_v36, 6  ;;  %v896_v44 = vpack.c.bf16 %v3167_v38, %v3161_v29  ;;  %v975_v47 = vadd.f32 %v965_v19, %v3167_v38 }
 0x522   :  { %v3179_v45 = vsel %vm156_vm1, 0.0, %v985_v39  ;;  %v986_v49 = vrot.slane %v977_v42, 6 }
 0x523   :  { %v3182_v50 = vsel %vm156_vm1, 0.0, %v982_v43  ;;  %v983_v52 = vrot.slane %v975_v47, 6  ;;  %v1007_v53 = vrot.slane %v3179_v45, 2  ;;  %v1029_v59 = vrot.slane %v3179_v45, 4 }
 0x524   :  { %v997_v55 = vsel %vm156_vm1, %v986_v49, 0.0  ;;  %v987_v57 = vsel %vm156_vm1, %v985_v39, %v986_v49  ;;  %v1002_v58 = vrot.slane %v3182_v50, 2  ;;  %v1024_v18 = vrot.slane %v3182_v50, 4 }
 0x525   :  { %v996_v15 = vsel %vm156_vm1, %v983_v52, 0.0  ;;  %v1008_v62 = vrot.slane %v987_v57, 2  ;;  %v1010_v0 = vrot.slane %v997_v55, 2  ;;  %v984_v1 = vsel %vm156_vm1, %v982_v43, %v983_v52 }
 0x526   :  { %v1003_v4 = vrot.slane %v984_v1, 2  ;;  %v1005_v5 = vrot.slane %v996_v15, 2  ;;  %v1030_v61 = vrot.slane %v987_v57, 4  ;;  %v1032_v3 = vrot.slane %v997_v55, 4 }
 0x527   :  { %v1009_v6 = vsel %vm177_vm3, %v1007_v53, %v1008_v62  ;;  %v1011_v7 = vsel %vm177_vm3, %v1008_v62, %v1010_v0  ;;  %v1025_v8 = vrot.slane %v984_v1, 4  ;;  %v1027_v63 = vrot.slane %v996_v15, 4 }
 0x528   :  { %v2718_v9 = vpack.i.bf16 %v1011_v7, %v1009_v6  ;;  %v1004_v13 = vsel %vm177_vm3, %v1002_v58, %v1003_v4  ;;  %v1006_v14 = vsel %vm177_vm3, %v1003_v4, %v1005_v5  ;;  %v1031_v19 = vsel %vm200_vm2, %v1029_v59, %v1030_v61 }
 0x529   :  { %v2723_v17 = vpack.i.bf16 %v1006_v14, %v1004_v13  ;;  %v1033_v20 = vsel %vm200_vm2, %v1030_v61, %v1032_v3  ;;  %v1026_v21 = vsel %vm200_vm2, %v1024_v18, %v1025_v8  ;;  %v1028_v23 = vsel %vm200_vm2, %v1025_v8, %v1027_v63 }
 0x52a   :  { %2719 = vrot.lane.b32.xlu1 %v2718_v9, %s2863_s23  ;;  %v2733_v26 = vpack.i.bf16 %v1033_v20, %v1031_v19  ;;  %v2728_v28 = vpack.i.bf16 %v1028_v23, %v1026_v21 }
 0x52b   :  { %2724 = vrot.lane.b32.xlu0 %v2723_v17, %s2863_s23 }
 0x52e   :  { %2734 = vrot.lane.b32.xlu1 %v2733_v26, %s2862_s22 }
 0x52f   :  { %2729 = vrot.lane.b32.xlu0 %v2728_v28, %s2862_s22 }
 0x532   :  { %1143 = vrot.lane.b32.xlu1 %v1063_v25, %s2864_s26 }
 0x533   :  { %1136 = vrot.lane.b32.xlu0 %v1063_v25, %s2865_s27 }
 0x536   :  { %1218 = vrot.lane.b32.xlu1 %v2967_v40, %s2867_s19 }
 0x537   :  { %1216 = vrot.lane.b32.xlu0 %v2959_v35, %s2867_s19 }
 0x53a   :  { %1222 = vrot.lane.b32.xlu1 %v2961_v37, %s2867_s19 }
 0x53b   :  { %1220 = vrot.lane.b32.xlu0 %v2957_v33, %s2867_s19  ;;  %s2870_s19 = smov 72  }
 0x59c   :  { %v2720_v30 = vpop.permute.xlu1 %2719 }
 0x59d   :  { %v2725_v31 = vpop.permute.xlu0 %2724  ;;  %v2722_v34 = vunpack.i.h.bf16 %v2720_v30  ;;  %v2721_v36 = vunpack.i.l.bf16 %v2720_v30 }
 0x59e   :  { %v2727_v39 = vunpack.i.h.bf16 %v2725_v31  ;;  %v2726_v42 = vunpack.i.l.bf16 %v2725_v31 }
 0x59f   :  { %v1049_v52 = vsel %vm223_vm4, %v987_v57, %v2722_v34  ;;  %v1048_v53 = vsel %vm223_vm4, %v3179_v45, %v2721_v36 }
 0x5a0   :  { %v2735_v16 = vpop.permute.xlu1 %2734  ;;  %v1047_v59 = vsel %vm223_vm4, %v984_v1, %v2727_v39  ;;  %v1046_v15 = vsel %vm223_vm4, %v3182_v50, %v2726_v42 }
 0x5a1   :  { %v2737_v43 = vunpack.i.h.bf16 %v2735_v16  ;;  %v2736_v47 = vunpack.i.l.bf16 %v2735_v16  ;;  %v2730_v49 = vpop.permute.xlu0 %2729 }
 0x5a2   :  { %v2732_v55 = vunpack.i.h.bf16 %v2730_v49  ;;  %v2731_v58 = vunpack.i.l.bf16 %v2730_v49  ;;  %v2810_v49 = vld [vmem:[%s3663_s2 + $0x30] sm:$0xff]  }
 0x5a3   :  { %v1052_v62 = vsel %vm228_vm5, %v1048_v53, %v2736_v47  ;;  %v1053_v0 = vsel %vm228_vm5, %v1049_v52, %v2737_v43  ;;  %2527 = vmatprep.subr.bf16.mxu0 %v2810_v49 }
 0x5a4   :  { %v1050_v2 = vsel %vm228_vm5, %v1046_v15, %v2731_v58  ;;  %v1051_v4 = vsel %vm228_vm5, %v1047_v59, %v2732_v55  ;;  %v1055_v57 = vpack.c.bf16 %v1053_v0, %v1052_v62  ;;  %v1144_v61 = vpop.permute.xlu1 %1143 }
 0x5a5   :  { %v1054_v5 = vpack.c.bf16 %v1051_v4, %v1050_v2  ;;  %v1137_v45 = vpop.permute.xlu0 %1136 }
 0x5a7   :  { %2517 = vmatprep.mubr.msk.bf16.mxu0 %vm251_vm6, %v1054_v5 }
 0x5a8   :  { %2518 = vmatmul.mubr.msk.bf16.vlgmr.msra.gmra.mrb[16].mxu0 %vm251_vm6, %v1055_v57  ;;  %v1219_v14 = vpop.permute.xlu1 %1218 }
 0x5a9   :  { %v1217_v50 = vpop.permute.xlu0 %1216  ;;  %2528 = vmatpush3.bf16.msra.mxu0 %v2810_v49 }
 0x5ac   :  { %v1223_v39 = vpop.permute.xlu1 %1222 }
 0x5ad   :  { %v1221_v28 = vpop.permute.xlu0 %1220 }
 0x67b   :  { %v2519_v1 = vpop.f32.mrb[16].mxu0 }
 0x67c   :  { %v1125_v3 = vadd.f32 %v2519_v1, %v1063_v25  ;;  %v1116_v6 = vpop.f32.mrb[17].mxu0 }
 0x67d   :  { %v1117_v7 = vadd.f32 %v1116_v6, %v1063_v25  ;;  %v2520_v8 = vpop.f32.mrb[18].mxu0  ;;  %v2811_v6 = vld [vmem:[%s3663_s2 + $0x38] ss:$0 sps:$4 sm:$0xff]  }
 0x67e   :  { %v1133_v63 = vmax.f32 %v1125_v3, 0.0  ;;  %v1128_v9 = vadd.f32 %v2520_v8, %v1063_v25  ;;  %v1119_v13 = vpop.f32.mrb[19].mxu0  ;;  %2638 = vmatprep.subr.msk.bf16.mxu0 %vm200_vm2, %v2811_v6 }
 0x67f   :  { %v1131_v18 = vmax.f32 %v1117_v7, 0.0  ;;  %v1120_v17 = vadd.f32 %v1119_v13, %v1063_v25 }
 0x680   :  { %v1141_v19 = vmul.f32 %v1137_v45, %v1133_v63  ;;  %v1134_v20 = vmax.f32 %v1128_v9, 0.0 }
 0x681   :  { %v1139_v21 = vmul.f32 %v1137_v45, %v1131_v18  ;;  %v1132_v23 = vmax.f32 %v1120_v17, 0.0 }
 0x682   :  { %v3231_v24 = vadd.f32 %v1144_v61, %v1141_v19  ;;  %v1142_v26 = vmul.f32 %v1137_v45, %v1134_v20 }
 0x683   :  { %v3233_v30 = vadd.f32 %v1144_v61, %v1139_v21  ;;  %v1140_v31 = vmul.f32 %v1137_v45, %v1132_v23 }
 0x684   :  { %v1230_v34 = vadd.f32 %v1221_v28, %v3231_v24  ;;  %v3236_v36 = vadd.f32 %v1144_v61, %v1142_v26 }
 0x685   :  { %v1228_v42 = vadd.f32 %v1217_v50, %v3233_v30  ;;  %v3239_v16 = vadd.f32 %v1144_v61, %v1140_v31 }
 0x686   :  { %v1239_v25 = vrot.slane %v1230_v34, 6  ;;  %v1151_v43 = vpack.c.bf16 %v3236_v36, %v3231_v24  ;;  %v1231_v47 = vadd.f32 %v1223_v39, %v3236_v36  ;;  %v3670_v39 = vsub.s32 4, %v2942_v11 }
 0x687   :  { %v1236_v52 = vrot.slane %v1228_v42, 6  ;;  %v1150_v53 = vpack.c.bf16 %v3239_v16, %v3233_v30  ;;  %v1229_v55 = vadd.f32 %v1219_v14, %v3239_v16  ;;  %v1334_v42 = vsel %vm200_vm2, %v2811_v6, 0 }
 0x688   :  { %v3251_v58 = vsel %vm156_vm1, 0.0, %v1239_v25  ;;  %v1240_v59 = vrot.slane %v1231_v47, 6  ;;  %2530 = vmatpush3.bf16.msra.mxu0 %v1334_v42  ;;  %v1317_v49 = vrot.slane %v3004_v10, %v3670_v39 }
 0x689   :  { %v3254_v15 = vsel %vm156_vm1, 0.0, %v1236_v52  ;;  %v1237_v62 = vrot.slane %v1229_v55, 6  ;;  %v1261_v0 = vrot.slane %v3251_v58, 2  ;;  %v1283_v57 = vrot.slane %v3251_v58, 4 }
 0x68a   :  { %v1251_v2 = vsel %vm156_vm1, %v1240_v59, 0.0  ;;  %v1241_v4 = vsel %vm156_vm1, %v1239_v25, %v1240_v59  ;;  %v1256_v5 = vrot.slane %v3254_v15, 2  ;;  %v1278_v21 = vrot.slane %v3254_v15, 4 }
 0x68b   :  { %v1250_v45 = vsel %vm156_vm1, %v1237_v62, 0.0  ;;  %v1262_v61 = vrot.slane %v1241_v4, 2  ;;  %v1264_v1 = vrot.slane %v1251_v2, 2  ;;  %v1238_v3 = vsel %vm156_vm1, %v1236_v52, %v1237_v62 }
 0x68c   :  { %v1257_v50 = vrot.slane %v1238_v3, 2  ;;  %v1259_v7 = vrot.slane %v1250_v45, 2  ;;  %v1284_v8 = vrot.slane %v1241_v4, 4  ;;  %v1286_v63 = vrot.slane %v1251_v2, 4 }
 0x68d   :  { %v1263_v9 = vsel %vm177_vm3, %v1261_v0, %v1262_v61  ;;  %v1265_v13 = vsel %vm177_vm3, %v1262_v61, %v1264_v1  ;;  %v1279_v14 = vrot.slane %v1238_v3, 4  ;;  %v1281_v18 = vrot.slane %v1250_v45, 4 }
 0x68e   :  { %v2738_v17 = vpack.i.bf16 %v1265_v13, %v1263_v9  ;;  %v1258_v19 = vsel %vm177_vm3, %v1256_v5, %v1257_v50  ;;  %v1260_v20 = vsel %vm177_vm3, %v1257_v50, %v1259_v7  ;;  %v1285_v26 = vsel %vm200_vm2, %v1283_v57, %v1284_v8 }
 0x68f   :  { %v2743_v23 = vpack.i.bf16 %v1260_v20, %v1258_v19  ;;  %v1287_v28 = vsel %vm200_vm2, %v1284_v8, %v1286_v63  ;;  %v1280_v31 = vsel %vm200_vm2, %v1278_v21, %v1279_v14  ;;  %v1282_v34 = vsel %vm200_vm2, %v1279_v14, %v1281_v18 }
 0x690   :  { %2739 = vrot.lane.b32.xlu1 %v2738_v17, %s2863_s23  ;;  %v2753_v25 = vpack.i.bf16 %v1287_v28, %v1285_v26  ;;  %v2748_v47 = vpack.i.bf16 %v1282_v34, %v1280_v31 }
 0x691   :  { %2744 = vrot.lane.b32.xlu0 %v2743_v23, %s2863_s23 }
 0x694   :  { %2754 = vrot.lane.b32.xlu1 %v2753_v25, %s2862_s22 }
 0x695   :  { %2749 = vrot.lane.b32.xlu0 %v2748_v47, %s2862_s22 }
 0x698   :  { %1397 = vrot.lane.b32.xlu1 %v1317_v49, %s2864_s26 }
 0x699   :  { %1390 = vrot.lane.b32.xlu0 %v1317_v49, %s2865_s27 }
 0x69c   :  { %1472 = vrot.lane.b32.xlu1 %v2967_v40, %s2868_s28 }
 0x69d   :  { %1470 = vrot.lane.b32.xlu0 %v2959_v35, %s2868_s28 }
 0x6a0   :  { %1476 = vrot.lane.b32.xlu1 %v2961_v37, %s2868_s28 }
 0x6a1   :  { %1474 = vrot.lane.b32.xlu0 %v2957_v33, %s2868_s28 }
 0x702   :  { %v2740_v52 = vpop.permute.xlu1 %2739 }
 0x703   :  { %v2745_v55 = vpop.permute.xlu0 %2744  ;;  %v2742_v59 = vunpack.i.h.bf16 %v2740_v52  ;;  %v2741_v62 = vunpack.i.l.bf16 %v2740_v52 }
 0x704   :  { %v2747_v10 = vunpack.i.h.bf16 %v2745_v55  ;;  %v2746_v0 = vunpack.i.l.bf16 %v2745_v55 }
 0x705   :  { %v1303_v61 = vsel %vm223_vm4, %v1241_v4, %v2742_v59  ;;  %v1302_v1 = vsel %vm223_vm4, %v3251_v58, %v2741_v62 }
 0x706   :  { %v2755_v2 = vpop.permute.xlu1 %2754  ;;  %v1301_v7 = vsel %vm223_vm4, %v1238_v3, %v2747_v10  ;;  %v1300_v8 = vsel %vm223_vm4, %v3254_v15, %v2746_v0 }
 0x707   :  { %v2757_v5 = vunpack.i.h.bf16 %v2755_v2  ;;  %v2756_v57 = vunpack.i.l.bf16 %v2755_v2  ;;  %v2750_v45 = vpop.permute.xlu0 %2749 }
 0x708   :  { %v2752_v6 = vunpack.i.h.bf16 %v2750_v45  ;;  %v2751_v50 = vunpack.i.l.bf16 %v2750_v45 }
 0x709   :  { %v1306_v63 = vsel %vm228_vm5, %v1302_v1, %v2756_v57  ;;  %v1307_v9 = vsel %vm228_vm5, %v1303_v61, %v2757_v5 }
 0x70a   :  { %v1304_v13 = vsel %vm228_vm5, %v1300_v8, %v2751_v50  ;;  %v1305_v14 = vsel %vm228_vm5, %v1301_v7, %v2752_v6  ;;  %v1309_v4 = vpack.c.bf16 %v1307_v9, %v1306_v63  ;;  %v1398_v17 = vpop.permute.xlu1 %1397  ;;  %v2812_v8 = vld [vmem:[%s3663_s2 + $0x3c] sm:$0xff]  }
 0x70b   :  { %v1308_v18 = vpack.c.bf16 %v1305_v14, %v1304_v13  ;;  %v1391_v58 = vpop.permute.xlu0 %1390  ;;  %2541 = vmatprep.subr.bf16.mxu0 %v2812_v8 }
 0x70d   :  { %2531 = vmatprep.mubr.msk.bf16.mxu0 %vm251_vm6, %v1308_v18 }
 0x70e   :  { %2532 = vmatmul.mubr.msk.bf16.vlgmr.msra.gmra.mrb[20].mxu0 %vm251_vm6, %v1309_v4  ;;  %v1473_v34 = vpop.permute.xlu1 %1472 }
 0x70f   :  { %v1471_v15 = vpop.permute.xlu0 %1470  ;;  %2542 = vmatpush3.bf16.msra.mxu0 %v2812_v8 }
 0x712   :  { %v1477_v61 = vpop.permute.xlu1 %1476 }
 0x713   :  { %v1475_v0 = vpop.permute.xlu0 %1474 }
 0x7e1   :  { %v2533_v3 = vpop.f32.mrb[20].mxu0 }
 0x7e2   :  { %v1379_v19 = vadd.f32 %v2533_v3, %v1317_v49  ;;  %v1370_v20 = vpop.f32.mrb[21].mxu0 }
 0x7e3   :  { %v1371_v21 = vadd.f32 %v1370_v20, %v1317_v49  ;;  %v2534_v23 = vpop.f32.mrb[22].mxu0 }
 0x7e4   :  { %v1387_v26 = vmax.f32 %v1379_v19, 0.0  ;;  %v1382_v28 = vadd.f32 %v2534_v23, %v1317_v49  ;;  %v1373_v31 = vpop.f32.mrb[23].mxu0 }
 0x7e5   :  { %v1385_v42 = vmax.f32 %v1371_v21, 0.0  ;;  %v1374_v25 = vadd.f32 %v1373_v31, %v1317_v49  ;;  %v2813_v31 = vld [vmem:[%s3663_s2 + $0x44] ss:$0 sps:$4 sm:$0xff]  }
 0x7e6   :  { %v1395_v47 = vmul.f32 %v1391_v58, %v1387_v26  ;;  %v1388_v52 = vmax.f32 %v1382_v28, 0.0  ;;  %2640 = vmatprep.subr.msk.bf16.mxu0 %vm200_vm2, %v2813_v31 }
 0x7e7   :  { %v1393_v55 = vmul.f32 %v1391_v58, %v1385_v42  ;;  %v1386_v59 = vmax.f32 %v1374_v25, 0.0 }
 0x7e8   :  { %v3303_v62 = vadd.f32 %v1398_v17, %v1395_v47  ;;  %v1396_v10 = vmul.f32 %v1391_v58, %v1388_v52 }
 0x7e9   :  { %v3305_v2 = vadd.f32 %v1398_v17, %v1393_v55  ;;  %v1394_v5 = vmul.f32 %v1391_v58, %v1386_v59 }
 0x7ea   :  { %v1484_v57 = vadd.f32 %v1475_v0, %v3303_v62  ;;  %v3308_v45 = vadd.f32 %v1398_v17, %v1396_v10 }
 0x7eb   :  { %v1482_v1 = vadd.f32 %v1471_v15, %v3305_v2  ;;  %v3311_v6 = vadd.f32 %v1398_v17, %v1394_v5 }
 0x7ec   :  { %v1493_v49 = vrot.slane %v1484_v57, 6  ;;  %v1405_v50 = vpack.c.bf16 %v3308_v45, %v3303_v62  ;;  %v1485_v7 = vadd.f32 %v1477_v61, %v3308_v45 }
 0x7ed   :  { %v1490_v63 = vrot.slane %v1482_v1, 6  ;;  %v1404_v9 = vpack.c.bf16 %v3311_v6, %v3305_v2  ;;  %v1483_v13 = vadd.f32 %v1473_v34, %v3311_v6 }
 0x7ee   :  { %v3323_v14 = vsel %vm156_vm1, 0.0, %v1493_v49  ;;  %v1494_v18 = vrot.slane %v1485_v7, 6 }
 0x7ef   :  { %v3326_v4 = vsel %vm156_vm1, 0.0, %v1490_v63  ;;  %v1491_v58 = vrot.slane %v1483_v13, 6  ;;  %v1515_v17 = vrot.slane %v3323_v14, 2  ;;  %v1537_v15 = vrot.slane %v3323_v14, 4 }
 0x7f0   :  { %v1505_v3 = vsel %vm156_vm1, %v1494_v18, 0.0  ;;  %v1495_v19 = vsel %vm156_vm1, %v1493_v49, %v1494_v18  ;;  %v1510_v20 = vrot.slane %v3326_v4, 2  ;;  %v1532_v61 = vrot.slane %v3326_v4, 4 }
 0x7f1   :  { %v1504_v21 = vsel %vm156_vm1, %v1491_v58, 0.0  ;;  %v1516_v23 = vrot.slane %v1495_v19, 2  ;;  %v1518_v26 = vrot.slane %v1505_v3, 2  ;;  %v1492_v28 = vsel %vm156_vm1, %v1490_v63, %v1491_v58 }
 0x7f2   :  { %v1511_v34 = vrot.slane %v1492_v28, 2  ;;  %v1513_v42 = vrot.slane %v1504_v21, 2  ;;  %v1538_v25 = vrot.slane %v1495_v19, 4  ;;  %v1540_v47 = vrot.slane %v1505_v3, 4  ;;  %v3356_v3 = vld [vmem:[%s3667_s6 + $0x8] sm:$0xff] }
 0x7f3   :  { %v1517_v52 = vsel %vm177_vm3, %v1515_v17, %v1516_v23  ;;  %v1519_v55 = vsel %vm177_vm3, %v1516_v23, %v1518_v26  ;;  %v1533_v59 = vrot.slane %v1492_v28, 4  ;;  %v1535_v10 = vrot.slane %v1504_v21, 4 }
 0x7f4   :  { %v2758_v0 = vpack.i.bf16 %v1519_v55, %v1517_v52  ;;  %v1512_v5 = vsel %vm177_vm3, %v1510_v20, %v1511_v34  ;;  %v1514_v57 = vsel %vm177_vm3, %v1511_v34, %v1513_v42  ;;  %v1539_v49 = vsel %vm200_vm2, %v1537_v15, %v1538_v25 }
 0x7f5   :  { %v2763_v1 = vpack.i.bf16 %v1514_v57, %v1512_v5  ;;  %v1541_v7 = vsel %vm200_vm2, %v1538_v25, %v1540_v47  ;;  %v1534_v8 = vsel %vm200_vm2, %v1532_v61, %v1533_v59  ;;  %v1536_v63 = vsel %vm200_vm2, %v1533_v59, %v1535_v10 }
 0x7f6   :  { %2759 = vrot.lane.b32.xlu1 %v2758_v0, %s2863_s23  ;;  %v3669_v13 = vsub.s32 5, %v2942_v11  ;;  %v1588_v18 = vsel %vm200_vm2, %v2813_v31, 0  ;;  %v2773_v58 = vpack.i.bf16 %v1541_v7, %v1539_v49  ;;  %v2768_v17 = vpack.i.bf16 %v1536_v63, %v1534_v8 }
 0x7f7   :  { %2764 = vrot.lane.b32.xlu0 %v2763_v1, %s2863_s23  ;;  %2544 = vmatpush3.bf16.msra.mxu0 %v1588_v18 }
 0x7f8   :  { %v1571_v20 = vrot.slane %v3356_v3, %v3669_v13 }
 0x7fa   :  { %2774 = vrot.lane.b32.xlu1 %v2773_v58, %s2862_s22 }
 0x7fb   :  { %2769 = vrot.lane.b32.xlu0 %v2768_v17, %s2862_s22 }
 0x7fe   :  { %1651 = vrot.lane.b32.xlu1 %v1571_v20, %s2864_s26 }
 0x7ff   :  { %1644 = vrot.lane.b32.xlu0 %v1571_v20, %s2865_s27 }
 0x802   :  { %1726 = vrot.lane.b32.xlu1 %v2967_v40, %s2869_s12 }
 0x803   :  { %1724 = vrot.lane.b32.xlu0 %v2959_v35, %s2869_s12 }
 0x806   :  { %1730 = vrot.lane.b32.xlu1 %v2961_v37, %s2869_s12 }
 0x807   :  { %1728 = vrot.lane.b32.xlu0 %v2957_v33, %s2869_s12 }
 0x868   :  { %v2760_v15 = vpop.permute.xlu1 %2759 }
 0x869   :  { %v2765_v21 = vpop.permute.xlu0 %2764  ;;  %v2762_v23 = vunpack.i.h.bf16 %v2760_v15  ;;  %v2761_v26 = vunpack.i.l.bf16 %v2760_v15 }
 0x86a   :  { %v2767_v31 = vunpack.i.h.bf16 %v2765_v21  ;;  %v2766_v34 = vunpack.i.l.bf16 %v2765_v21 }
 0x86b   :  { %v1557_v55 = vsel %vm223_vm4, %v1495_v19, %v2762_v23  ;;  %v1556_v59 = vsel %vm223_vm4, %v3323_v14, %v2761_v26 }
 0x86c   :  { %v2775_v42 = vpop.permute.xlu1 %2774  ;;  %v1555_v5 = vsel %vm223_vm4, %v1492_v28, %v2767_v31  ;;  %v1554_v57 = vsel %vm223_vm4, %v3326_v4, %v2766_v34 }
 0x86d   :  { %v2777_v25 = vunpack.i.h.bf16 %v2775_v42  ;;  %v2776_v47 = vunpack.i.l.bf16 %v2775_v42  ;;  %v2770_v52 = vpop.permute.xlu0 %2769 }
 0x86e   :  { %v2772_v10 = vunpack.i.h.bf16 %v2770_v52  ;;  %v2771_v0 = vunpack.i.l.bf16 %v2770_v52 }
 0x86f   :  { %v1560_v61 = vsel %vm228_vm5, %v1556_v59, %v2776_v47  ;;  %v1561_v1 = vsel %vm228_vm5, %v1557_v55, %v2777_v25 }
 0x870   :  { %v1558_v49 = vsel %vm228_vm5, %v1554_v57, %v2771_v0  ;;  %v1559_v7 = vsel %vm228_vm5, %v1555_v5, %v2772_v10  ;;  %v1563_v19 = vpack.c.bf16 %v1561_v1, %v1560_v61  ;;  %v1652_v63 = vpop.permute.xlu1 %1651 }
 0x871   :  { %v1562_v8 = vpack.c.bf16 %v1559_v7, %v1558_v49  ;;  %v1645_v14 = vpop.permute.xlu0 %1644 }
 0x873   :  { %2545 = vmatprep.mubr.msk.bf16.mxu0 %vm251_vm6, %v1562_v8 }
 0x874   :  { %2546 = vmatmul.mubr.msk.bf16.vlgmr.msra.gmra.mrb[24].mxu0 %vm251_vm6, %v1563_v19  ;;  %v1727_v31 = vpop.permute.xlu1 %1726 }
 0x875   :  { %v1725_v4 = vpop.permute.xlu0 %1724 }
 0x878   :  { %v1731_v49 = vpop.permute.xlu1 %1730 }
 0x879   :  { %v1729_v0 = vpop.permute.xlu0 %1728 }
 0x947   :  { %v2547_v28 = vpop.f32.mrb[24].mxu0 }
 0x948   :  { %v1633_v18 = vadd.f32 %v2547_v28, %v1571_v20  ;;  %v1624_v58 = vpop.f32.mrb[25].mxu0 }
 0x949   :  { %v1625_v17 = vadd.f32 %v1624_v58, %v1571_v20  ;;  %v2548_v15 = vpop.f32.mrb[26].mxu0 }
 0x94a   :  { %v1641_v21 = vmax.f32 %v1633_v18, 0.0  ;;  %v1636_v23 = vadd.f32 %v2548_v15, %v1571_v20  ;;  %v1627_v26 = vpop.f32.mrb[27].mxu0  ;;  %v2814_v18 = vld [vmem:[%s3663_s2 + $0x48] sm:$0xff]  }
 0x94b   :  { %v1639_v34 = vmax.f32 %v1625_v17, 0.0  ;;  %v1628_v42 = vadd.f32 %v1627_v26, %v1571_v20  ;;  %2555 = vmatprep.subr.bf16.mxu0 %v2814_v18 }
 0x94c   :  { %v1649_v25 = vmul.f32 %v1645_v14, %v1641_v21  ;;  %v1642_v47 = vmax.f32 %v1636_v23, 0.0  ;;  %2556 = vmatpush3.bf16.msra.mxu0 %v2814_v18 }
 0x94d   :  { %v1647_v52 = vmul.f32 %v1645_v14, %v1639_v34  ;;  %v1640_v55 = vmax.f32 %v1628_v42, 0.0 }
 0x94e   :  { %v3380_v59 = vadd.f32 %v1652_v63, %v1649_v25  ;;  %v1650_v10 = vmul.f32 %v1645_v14, %v1642_v47 }
 0x94f   :  { %v3382_v5 = vadd.f32 %v1652_v63, %v1647_v52  ;;  %v1648_v57 = vmul.f32 %v1645_v14, %v1640_v55 }
 0x950   :  { %v1738_v61 = vadd.f32 %v1729_v0, %v3380_v59  ;;  %v3385_v1 = vadd.f32 %v1652_v63, %v1650_v10  ;;  %v2298_v10 = vld [vmem:[%s3664_s3 + $0x1c] sm:$0xf] }
 0x951   :  { %v1736_v7 = vadd.f32 %v1725_v4, %v3382_v5  ;;  %v3388_v8 = vadd.f32 %v1652_v63, %v1648_v57  ;;  %2631 = vmatprep.subr.msk.bf16.mxu1 %vm200_vm2, %v2298_v10 }
 0x952   :  { %v1747_v20 = vrot.slane %v1738_v61, 6  ;;  %v1659_v19 = vpack.c.bf16 %v3385_v1, %v3380_v59  ;;  %v1739_v28 = vadd.f32 %v1731_v49, %v3385_v1 }
 0x953   :  { %v1744_v14 = vrot.slane %v1736_v7, 6  ;;  %v1658_v58 = vpack.c.bf16 %v3388_v8, %v3382_v5  ;;  %v1737_v17 = vadd.f32 %v1727_v31, %v3388_v8  ;;  %v2815_v7 = vld [vmem:[%s3663_s2 + $0x50] ss:$0 sps:$4 sm:$0xff]  }
 0x954   :  { %v3400_v4 = vsel %vm156_vm1, 0.0, %v1747_v20  ;;  %v1748_v63 = vrot.slane %v1739_v28, 6  ;;  %2642 = vmatprep.subr.msk.bf16.mxu0 %vm200_vm2, %v2815_v7 }
 0x955   :  { %v3403_v15 = vsel %vm156_vm1, 0.0, %v1744_v14  ;;  %v1745_v21 = vrot.slane %v1737_v17, 6  ;;  %v1769_v23 = vrot.slane %v3400_v4, 2  ;;  %v1791_v31 = vrot.slane %v3400_v4, 4 }
 0x956   :  { %v1759_v26 = vsel %vm156_vm1, %v1748_v63, 0.0  ;;  %v1749_v34 = vsel %vm156_vm1, %v1747_v20, %v1748_v63  ;;  %v1764_v42 = vrot.slane %v3403_v15, 2  ;;  %v1786_v13 = vrot.slane %v3403_v15, 4 }
 0x957   :  { %v1758_v25 = vsel %vm156_vm1, %v1745_v21, 0.0  ;;  %v1770_v47 = vrot.slane %v1749_v34, 2  ;;  %v1772_v52 = vrot.slane %v1759_v26, 2  ;;  %v1746_v55 = vsel %vm156_vm1, %v1744_v14, %v1745_v21 }
 0x958   :  { %v1765_v0 = vrot.slane %v1746_v55, 2  ;;  %v1767_v57 = vrot.slane %v1758_v25, 2  ;;  %v1792_v61 = vrot.slane %v1749_v34, 4  ;;  %v1794_v49 = vrot.slane %v1759_v26, 4 }
 0x959   :  { %v1771_v20 = vsel %vm177_vm3, %v1769_v23, %v1770_v47  ;;  %v1773_v28 = vsel %vm177_vm3, %v1770_v47, %v1772_v52  ;;  %v1787_v18 = vrot.slane %v1746_v55, 4  ;;  %v1789_v14 = vrot.slane %v1758_v25, 4  ;;  %v2314_v52 = vld [vmem:[%s3664_s3 + $0x4] sm:$0xf] }
 0x95a   :  { %v2778_v17 = vpack.i.bf16 %v1773_v28, %v1771_v20  ;;  %v1766_v63 = vsel %vm177_vm3, %v1764_v42, %v1765_v0  ;;  %v1768_v21 = vsel %vm177_vm3, %v1765_v0, %v1767_v57  ;;  %v1793_v39 = vsel %vm200_vm2, %v1791_v31, %v1792_v61 }
 0x95b   :  { %v2783_v26 = vpack.i.bf16 %v1768_v21, %v1766_v63  ;;  %v1795_v22 = vsel %vm200_vm2, %v1792_v61, %v1794_v49  ;;  %v1788_v23 = vsel %vm200_vm2, %v1786_v13, %v1787_v18  ;;  %v1790_v25 = vsel %vm200_vm2, %v1787_v18, %v1789_v14 }
 0x95c   :  { %2779 = vrot.lane.b32.xlu1 %v2778_v17, %s2863_s23  ;;  %v1842_v47 = vsel %vm200_vm2, %v2815_v7, 0  ;;  %v403_v42 = vsel %vm200_vm2, %v2298_v10, 0  ;;  %v2793_v31 = vpack.i.bf16 %v1795_v22, %v1793_v39  ;;  %v2788_v0 = vpack.i.bf16 %v1790_v25, %v1788_v23 }
 0x95d   :  { %2784 = vrot.lane.b32.xlu0 %v2783_v26, %s2863_s23  ;;  %2558 = vmatpush3.bf16.msra.mxu0 %v1842_v47  ;;  %v149_v13 = vpack.c.bf16 %v2961_v37, %v2957_v33  ;;  %v148_v10 = vpack.c.bf16 %v2967_v40, %v2959_v35  ;;  %v1824_v57 = vsub.s32 6, %v2942_v11 }
 0x95e   :  { %2480 = vmatpush3.bf16.msra.mxu1 %v403_v42 }
 0x95f   :  { %2633 = vmatprep.subr.msk.bf16.mxu1 %vm200_vm2, %v2314_v52  ;;  %v3447_v22 = vrot.slane %v3356_v3, %v1824_v57 }
 0x960   :  { %2794 = vrot.lane.b32.xlu1 %v2793_v31, %s2862_s22 }
 0x961   :  { %2789 = vrot.lane.b32.xlu0 %v2788_v0, %s2862_s22 }
 0x964   :  { %394 = vrot.lane.b32.xlu1 %v149_v13, %s2870_s19 }
 0x965   :  { %392 = vrot.lane.b32.xlu0 %v148_v10, %s2870_s19  ;;  %v2816_v10 = vld [vmem:[%s3665_s4] sm:$0xff]  }
 0x968   :  { %1905 = vrot.lane.b32.xlu1 %v3447_v22, %s2864_s26 }
 0x969   :  { %1898 = vrot.lane.b32.xlu0 %v3447_v22, %s2865_s27 }
 0x9ce   :  { %v2780_v33 = vpop.permute.xlu1 %2779 }
 0x9cf   :  { %v2785_v37 = vpop.permute.xlu0 %2784  ;;  %v2782_v39 = vunpack.i.h.bf16 %v2780_v33  ;;  %v2781_v35 = vunpack.i.l.bf16 %v2780_v33  ;;  %v2817_v33 = vld [vmem:[%s3665_s4 + $0x8] sm:$0xff]  }
 0x9d0   :  { %v2787_v40 = vunpack.i.h.bf16 %v2785_v37  ;;  %v2786_v61 = vunpack.i.l.bf16 %v2785_v37  ;;  %v2818_v37 = vld [vmem:[%s3665_s4 + $0x10] sm:$0xff]  }
 0x9d1   :  { %v1811_v18 = vsel %vm223_vm4, %v1749_v34, %v2782_v39  ;;  %v1810_v3 = vsel %vm223_vm4, %v3400_v4, %v2781_v35  ;;  %v653_v4 = vsel %vm200_vm2, %v2314_v52, 0  ;;  %v2334_v52 = vld [vmem:[%s3664_s3 + $0xc] sm:$0xf]  ;;  %v2819_v39 = vld [vmem:[%s3665_s4 + $0x18] sm:$0xff]   ;;  %v2820_v35 = vld [vmem:[%s3666_s5] sm:$0xff]  }
 0x9d2   :  { %v2795_v49 = vpop.permute.xlu1 %2794  ;;  %v1809_v63 = vsel %vm223_vm4, %v1746_v55, %v2787_v40  ;;  %v1808_v21 = vsel %vm223_vm4, %v3403_v15, %v2786_v61  ;;  %v2324_v15 = vld [vmem:[%s3664_s3 + $0x8] sm:$0xf]  ;;  %v1161_v48 = vsel %vm200_vm2, %v2334_v52, 0  ;;  %v2822_v61 = vld [vmem:[%s3666_s5 + $0x10] sm:$0xff]  }
 0x9d3   :  { %v2797_v7 = vunpack.i.h.bf16 %v2795_v49  ;;  %v2796_v20 = vunpack.i.l.bf16 %v2795_v49  ;;  %v2790_v28 = vpop.permute.xlu0 %2789  ;;  %v907_v55 = vsel %vm200_vm2, %v2324_v15, 0  ;;  %v2821_v40 = vld [vmem:[%s3666_s5 + $0x8] sm:$0xff]   ;;  %v2823_v49 = vld [vmem:[%s3666_s5 + $0x18] sm:$0xff]  }
 0x9d4   :  { %v2792_v14 = vunpack.i.h.bf16 %v2790_v28  ;;  %v2791_v17 = vunpack.i.l.bf16 %v2790_v28  ;;  %v3585_v28 = vld [vmem:[%s3667_s6] sm:$0xff] }
 0x9d5   :  { %v1814_v26 = vsel %vm228_vm5, %v1810_v3, %v2796_v20  ;;  %v1815_v23 = vsel %vm228_vm5, %v1811_v18, %v2797_v7  ;;  %v2824_v7 = vld [vmem:[%s3666_s5 + $0x20] sm:$0xff]   ;;  %v2825_v20 = vld [vmem:[%s3666_s5 + $0x28] sm:$0xff]   ;;  %v3672_v18 = vsub.s32 3, %v2942_v11 }
 0x9d6   :  { %v1812_v25 = vsel %vm228_vm5, %v1808_v21, %v2791_v17  ;;  %v1813_v47 = vsel %vm228_vm5, %v1809_v63, %v2792_v14  ;;  %v1817_v31 = vpack.c.bf16 %v1815_v23, %v1814_v26  ;;  %v395_v0 = vpop.permute.xlu1 %394  ;;  %v3673_v63 = vsub.s32 4, %v2942_v11 }
 0x9d7   :  { %v1816_v42 = vpack.c.bf16 %v1813_v47, %v1812_v25  ;;  %v393_v34 = vpop.permute.xlu0 %392  ;;  %v1981_v3 = vrot.slane %v3585_v28, %v3672_v18 }
 0x9d8   :  { %2481 = vmatprep.mubr.msk.bf16.mxu1 %vm223_vm4, %v393_v34  ;;  %v1993_v21 = vrot.slane %v3585_v28, %v3673_v63 }
 0x9d9   :  { %2482 = vmatmul.mubr.msk.bf16.vlgmr.msra.gmra.mrb[0].mxu1 %vm223_vm4, %v395_v0  ;;  %2559 = vmatprep.mubr.msk.bf16.mxu0 %vm251_vm6, %v1816_v42  ;;  %v3674_v42 = vsub.s32 5, %v2942_v11 }
 0x9da   :  { %2495 = vmatprep.mubr.msk.bf16.mxu1 %vm223_vm4, %v642_v60  ;;  %2560 = vmatmul.mubr.msk.bf16.vlgmr.msra.gmra.mrb[28].mxu0 %vm251_vm6, %v1817_v31  ;;  %v2364_v60 = vld [vmem:[%s3664_s3 + $0x18] sm:$0xf] }
 0x9db   :  { %2494 = vmatpush3.bf16.msra.mxu1 %v653_v4  ;;  %v1923_v27 = vsel %vm200_vm2, %v2364_v60, 0  ;;  %v1899_v24 = vpop.permute.xlu0 %1898  ;;  %v2001_v34 = vrot.slane %v3585_v28, %v3674_v42 }
 0x9dc   :  { %2635 = vmatprep.subr.msk.bf16.mxu1 %vm200_vm2, %v2324_v15 }
 0x9e5   :  { %2496 = vmatmul.mubr.msk.bf16.vlgmr.msra.gmra.mrb[0].mxu1 %vm223_vm4, %v643_v56  ;;  %v1669_v56 = vsel %vm200_vm2, %v2354_v51, 0 }
 0x9e6   :  { %2509 = vmatprep.mubr.msk.bf16.mxu1 %vm223_vm4, %v896_v44  ;;  %2508 = vmatpush3.bf16.msra.mxu1 %v907_v55 }
 0x9e7   :  { %2637 = vmatprep.subr.msk.bf16.mxu1 %vm200_vm2, %v2334_v52 }
 0x9f1   :  { %2510 = vmatmul.mubr.msk.bf16.vlgmr.msra.gmra.mrb[0].mxu1 %vm223_vm4, %v897_v41 }
 0x9f2   :  { %2523 = vmatprep.mubr.msk.bf16.mxu1 %vm223_vm4, %v1150_v53  ;;  %2522 = vmatpush3.bf16.msra.mxu1 %v1161_v48 }
 0x9f3   :  { %2639 = vmatprep.subr.msk.bf16.mxu1 %vm200_vm2, %v2344_v54 }
 0x9fd   :  { %2524 = vmatmul.mubr.msk.bf16.vlgmr.msra.gmra.mrb[0].mxu1 %vm223_vm4, %v1151_v43 }
 0x9fe   :  { %2537 = vmatprep.mubr.msk.bf16.mxu1 %vm223_vm4, %v1404_v9  ;;  %2536 = vmatpush3.bf16.msra.mxu1 %v1415_v46 }
 0x9ff   :  { %2641 = vmatprep.subr.msk.bf16.mxu1 %vm200_vm2, %v2354_v51 }
 0xa09   :  { %2538 = vmatmul.mubr.msk.bf16.vlgmr.msra.gmra.mrb[0].mxu1 %vm223_vm4, %v1405_v50  ;;  %v1906_v50 = vpop.permute.xlu1 %1905 }
 0xa0a   :  { %2551 = vmatprep.mubr.msk.bf16.mxu1 %vm223_vm4, %v1658_v58  ;;  %2550 = vmatpush3.bf16.msra.mxu1 %v1669_v56 }
 0xa0b   :  { %2643 = vmatprep.subr.msk.bf16.mxu1 %vm200_vm2, %v2364_v60 }
 0xa15   :  { %2552 = vmatmul.mubr.msk.bf16.vlgmr.msra.gmra.mrb[0].mxu1 %vm223_vm4, %v1659_v19 }
 0xa16   :  { %2564 = vmatpush3.bf16.msra.mxu1 %v1923_v27 }
 0xaad   :  { %v2561_v29 = vpop.f32.mrb[28].mxu0 }
 0xaae   :  { %v1887_v32 = vadd.f32 %v2561_v29, %v3447_v22  ;;  %v1878_v38 = vpop.f32.mrb[29].mxu0 }
 0xaaf   :  { %v1879_v41 = vadd.f32 %v1878_v38, %v3447_v22  ;;  %v2562_v44 = vpop.f32.mrb[30].mxu0 }
 0xab0   :  { %v1895_v30 = vmax.f32 %v1887_v32, 0.0  ;;  %v1890_v36 = vadd.f32 %v2562_v44, %v3447_v22  ;;  %v1881_v16 = vpop.f32.mrb[31].mxu0 }
 0xab1   :  { %v1893_v43 = vmax.f32 %v1879_v41, 0.0  ;;  %v1882_v53 = vadd.f32 %v1881_v16, %v3447_v22  ;;  %v2871_v22 = vmov 0.0  }
 0xab2   :  { %v1896_v62 = vmax.f32 %v1890_v36, 0.0  ;;  %v1903_v2 = vmul.f32 %v1899_v24, %v1895_v30  ;;  %2569 = vmatprep.subr.bf16.mxu0 %v2871_v22  ;;  %2581 = vmatprep.subr.bf16.mxu1 %v2871_v22 }
 0xab3   :  { %v1894_v45 = vmax.f32 %v1882_v53, 0.0  ;;  %v1901_v6 = vmul.f32 %v1899_v24, %v1893_v43  ;;  %2570 = vmatpush3.bf16.msra.mxu0 %v2816_v10  ;;  %2577 = vmatprep.mubr.msk.bf16.mxu0 %vm2872_vm7, %v2871_v22 }
 0xab4   :  { %v1904_v9 = vmul.f32 %v1899_v24, %v1896_v62  ;;  %v1910_v5 = vadd.f32 %v1906_v50, %v1903_v2  ;;  %2571 = vmatprep.subr.bf16.mxu0 %v2871_v22 }
 0xab5   :  { %v1902_v59 = vmul.f32 %v1899_v24, %v1894_v45  ;;  %v1908_v8 = vadd.f32 %v1906_v50, %v1901_v6 }
 0xab6   :  { %v1911_v1 = vadd.f32 %v1906_v50, %v1904_v9 }
 0xab7   :  { %v1909_v19 = vadd.f32 %v1906_v50, %v1902_v59  ;;  %2572 = vmatpush3.bf16.msra.mxu0 %v2817_v33 }
 0xab8   :  { %v1913_v58 = vpack.c.bf16 %v1911_v1, %v1910_v5  ;;  %2573 = vmatprep.subr.bf16.mxu0 %v2871_v22 }
 0xab9   :  { %v1912_v13 = vpack.c.bf16 %v1909_v19, %v1908_v8 }
 0xabb   :  { %2565 = vmatprep.mubr.msk.bf16.mxu1 %vm223_vm4, %v1912_v13  ;;  %2574 = vmatpush3.bf16.msra.mxu0 %v2818_v37 }
 0xabc   :  { %2566 = vmatmul.mubr.msk.bf16.vlgmr.msra.gmra.mrb[0].mxu1 %vm223_vm4, %v1913_v58  ;;  %2575 = vmatprep.subr.bf16.mxu0 %v2871_v22 }
 0xabd   :  { %2597 = vmatprep.mubr.msk.bf16.mxu1 %vm2872_vm7, %v2871_v22  ;;  %2582 = vmatpush3.bf16.msra.mxu1 %v2820_v35  ;;  %v2827_v35 = vld [vmem:[%s3666_s5 + $0x38] sm:$0xff]  }
 0xabe   :  { %2583 = vmatprep.subr.bf16.mxu1 %v2871_v22 }
 0xabf   :  { %2576 = vmatpush3.bf16.msra.mxu0 %v2819_v39  ;;  %v2826_v39 = vld [vmem:[%s3666_s5 + $0x30] sm:$0xff]   ;;  %s2874_s5 = smov [#allocation2]  }
 0xac0   :  { %s2281_s30 = sshll.u32 %s2874_s5, 4  ;;  %s2282_s30 = int_to_ptr.vmem [resolvable:$true] %s2281_s30 }
 0xac1   :  { %2584 = vmatpush3.bf16.msra.mxu1 %v2821_v40  ;;  %v2040_v40 = vrot.slane %v3585_v28, %v1824_v57  ;;  %s2838_s15 = scalar_lea.vmem %s2282_s30, 512  ;;  %p2843_p1 = scmp.lt.s32.totalorder %s2282_s30, %s2282_s30 }
 0xac2   :  { %2585 = vmatprep.subr.bf16.mxu1 %v2871_v22  ;;  %p2839_p0 = scmp.ne.s32.totalorder %s2282_s30, %s2838_s15  ;;  %p2844_p2 = scmp.lt.s32.totalorder %s2838_s15, %s2838_s15 }
 0xac4   :  { %p2845_p3 = por %p2844_p2, %p2843_p1 }
 0xac5   :  { %2586 = vmatpush3.bf16.msra.mxu1 %v2822_v61 }
 0xac6   :  { %2587 = vmatprep.subr.bf16.mxu1 %v2871_v22  ;;  %p2846_p4 = pnand %p2845_p3, %p2839_p0 }
 0xac9   :  { %2588 = vmatpush3.bf16.msra.mxu1 %v2823_v49 }
 0xaca   :  { %2589 = vmatprep.subr.bf16.mxu1 %v2871_v22 }
 0xacd   :  { %2590 = vmatpush3.bf16.msra.mxu1 %v2824_v7 }
 0xace   :  { %2591 = vmatprep.subr.bf16.mxu1 %v2871_v22 }
 0xad1   :  { %2592 = vmatpush3.bf16.msra.mxu1 %v2825_v20 }
 0xad2   :  { %2593 = vmatprep.subr.bf16.mxu1 %v2871_v22 }
 0xad5   :  { %2594 = vmatpush3.bf16.msra.mxu1 %v2826_v39 }
 0xad6   :  { %2595 = vmatprep.subr.bf16.mxu1 %v2871_v22 }
 0xad9   :  { %2596 = vmatpush3.bf16.msra.mxu1 %v2827_v35 }
 0xb8f   :  { %v2567_v14 = vpop.f32.mrb[0].mxu1 }
 0xb90   :  { %v1984_v17 = vadd.f32 %v2567_v14, %v1981_v3  ;;  %v1959_v26 = vpop.f32.mrb[1].mxu1 }
 0xb91   :  { %v1982_v23 = vadd.f32 %v1981_v3, %v1959_v26  ;;  %v2568_v25 = vpop.f32.mrb[2].mxu1 }
 0xb92   :  { %v1988_v47 = vmax.f32 %v1984_v17, 0.0  ;;  %v1985_v31 = vadd.f32 %v2568_v25, %v1981_v3  ;;  %v1962_v0 = vpop.f32.mrb[3].mxu1  ;;  %v2135_v17 = vsub.s32 7, %v2942_v11 }
 0xb93   :  { %v1986_v4 = vmax.f32 %v1982_v23, 0.0  ;;  %v1983_v15 = vadd.f32 %v1981_v3, %v1962_v0 }
 0xb94   :  { %v1996_v55 = vmul.f32 %v1993_v21, %v1988_v47  ;;  %v1989_v52 = vmax.f32 %v1985_v31, 0.0  ;;  %v2136_v63 = vrot.slane %v3585_v28, %v2135_v17 }
 0xb95   :  { %v1994_v48 = vmul.f32 %v1993_v21, %v1986_v4  ;;  %v1987_v54 = vmax.f32 %v1983_v15, 0.0 }
 0xb96   :  { %v3596_v46 = vadd.f32 %v2001_v34, %v1996_v55  ;;  %v1997_v51 = vmul.f32 %v1993_v21, %v1989_v52 }
 0xb97   :  { %v3598_v56 = vadd.f32 %v2001_v34, %v1994_v48  ;;  %v1995_v60 = vmul.f32 %v1993_v21, %v1987_v54 }
 0xb98   :  { %v3600_v27 = vadd.f32 %v2001_v34, %v1997_v51  ;;  %v2015_v32 = vsel %vm72_vm0, %v3596_v46, 0.0 }
 0xb99   :  { %v3602_v29 = vadd.f32 %v2001_v34, %v1995_v60  ;;  %v2006_v41 = vsel %vm72_vm0, %v3598_v56, 0.0  ;;  %v2873_v34 = vmov 1966171168  }
 0xb9a   :  { %v2016_v38 = vsel %vm72_vm0, %v3600_v27, 0.0  ;;  %v2233_v31 = vunpack.c.l.s4 %v2873_v34 }
 0xb9b   :  { %v2017_v44 = vadd.f32 %v2016_v38, %v2015_v32  ;;  %v2007_v24 = vsel %vm72_vm0, %v3602_v29, 0.0 }
 0xb9c   :  { %v2008_v30 = vadd.f32 %v2007_v24, %v2006_v41  ;;  %v2234_v0 = vunpack.c.0.s8 %v2233_v31  ;;  %v2835_v24 = vld [vmem:[%s3661_s0 + $0x8] sm:$0xff] }
 0xb9d   :  { %v2018_v36 = vrot.slane %v2017_v44, 4 }
 0xb9e   :  { %v2009_v16 = vrot.slane %v2008_v30, 4  ;;  %v2237_v4 = vsub.s32 %v2234_v0, %v2942_v11  ;;  %v2834_v11 = vld [vmem:[%s3661_s0] sm:$0xff] }
 0xb9f   :  { %v2019_v43 = vadd.f32 %v2018_v36, %v2017_v44 }
 0xba0   :  { %v2010_v53 = vadd.f32 %v2009_v16, %v2008_v30 }
 0xba1   :  { %v2020_v62 = vrot.slane %v2019_v43, 2 }
 0xba2   :  { %v2011_v2 = vrot.slane %v2010_v53, 2 }
 0xba3   :  { %v2021_v45 = vadd.f32 %v2020_v62, %v2019_v43 }
 0xba4   :  { %v2012_v6 = vadd.f32 %v2011_v2, %v2010_v53 }
 0xba5   :  { %v2022_v50 = vrot.slane %v2021_v45, 1 }
 0xba6   :  { %v2013_v9 = vrot.slane %v2012_v6, 1 }
 0xba7   :  { %v2023_v59 = vadd.f32 %v2022_v50, %v2021_v45 }
 0xba8   :  { %v2014_v5 = vadd.f32 %v2013_v9, %v2012_v6 }
 0xba9   :  { %v2026_v1 = vmul.f32 0.0625, %v2023_v59 }
 0xbaa   :  { %v2025_v8 = vmul.f32 0.0625, %v2014_v5 }
 0xbab   :  { %v2028_v19 = vpack.c.bf16 %v2026_v1, %v2026_v1 }
 0xbac   :  { %v2027_v58 = vpack.c.bf16 %v2025_v8, %v2025_v8 }
 0xbad   :  { %v2044_v13 = vunpack.c.l.b16 %v2028_v19 }
 0xbae   :  { %v2043_v10 = vunpack.c.l.b16 %v2027_v58 }
 0xbb0   :  { %v2046_v33 = vsel %vm2045_vm8, %v2044_v13, %v2043_v10 }
 0xbb1   :  { %v2047_v37 = vpack.c.b16 %v2046_v33, %v2046_v33 }
 0xbb3   :  { %2578 = vmatmul.mubr.msk.bf16.vlgmr.msra.gmra.mrb[32].mxu0 %vm72_vm0, %v2047_v37 }
 0xc86   :  { %v2109_v61 = vpop.f32.mrb[32].mxu0 }
 0xc87   :  { %v2110_v49 = vadd.f32 %v2109_v61, %v2040_v40  ;;  %v2579_v7 = vpop.f32.mrb[33].mxu0 }
 0xc88   :  { %v2112_v20 = vpop.f32.mrb[34].mxu0 }
 0xc89   :  { %v2115_v18 = vmax.f32 %v2110_v49, 0.0  ;;  %v2580_v3 = vpop.f32.mrb[35].mxu0 }
 0xc8b   :  { %v2116_v14 = vpack.c.bf16 %v2115_v18, %v2115_v18 }
 0xc8d   :  { %2598 = vmatmul.mubr.bf16.vlgmr.msra.gmra.mrb[4].mxu1 %v2116_v14 }
 0xd60   :  { %v2219_v21 = vpop.f32.mrb[4].mxu1 }
 0xd61   :  { %v2220_v26 = vadd.f32 %v2219_v21, %v2136_v63  ;;  %v2599_v22 = vpop.f32.mrb[5].mxu1 }
 0xd62   :  { %v2222_v23 = vpop.f32.mrb[6].mxu1 }
 0xd63   :  { %v2380_v25 = vmul.f32 -1.442695, %v2220_v26  ;;  %v2600_v47 = vpop.f32.mrb[7].mxu1 }
 0xd65   :  { %2828 = vpow2.f32 %v2380_v25 }
 0xd6f   :  { %v2829_v57 = vpop.eup %2828 }
 0xd70   :  { %v2228_v42 = vadd.f32 1.0, %v2829_v57 }
 0xd72   :  { %2830 = vrcp.f32 %v2228_v42 }
 0xd7c   :  { %v2831_v15 = vpop.eup %2830 }
 0xd7d   :  { %v2238_v55 = vrot.slane %v2831_v15, %v2237_v4 }
 0xd7f   :  { %v2239_v52 = vcombine.high %v2238_v55, %v2238_v55  ;;  %v2246_v48 = vrot.slane %v2238_v55, %v2237_v4 }
 0xd81   :  { %v2253_v28 = vrot.slane %v2239_v52, %v2237_v4  ;;  %v2257_v54 = vrot.slane %v2246_v48, %v2945_v12 }
 0xd83   :  { %v2261_v51 = vrot.slane %v2253_v28, %v2945_v12  ;;  %v2264_v60 = vmul.f32 %v2257_v54, %v3598_v56  ;;  %v2265_v32 = vmul.f32 %v2257_v54, %v3602_v29  ;;  %v2836_v56 = vld [vmem:[%s3661_s0 + $0x10] sm:$0xff] }
 0xd85   :  { %v2266_v38 = vmul.f32 %v2261_v51, %v3596_v46  ;;  %v2267_v41 = vmul.f32 %v2261_v51, %v3600_v27  ;;  %v2268_v44 = vadd.f32 %v2834_v11, %v2264_v60  ;;  %v2269_v12 = vadd.f32 %v2835_v24, %v2265_v32  ;;  %v2837_v46 = vld [vmem:[%s3661_s0 + $0x18] sm:$0xff] }
 0xd87   :  { %v2270_v29 = vadd.f32 %v2836_v56, %v2266_v38  ;;  %v2271_v27 = vadd.f32 %v2837_v46, %v2267_v41  ;;  %2272 = vst.msk [vmem:[#allocation2] sm:$0xff] %vm72_vm0, %v2268_v44  ;;  %2273 = vst.msk [vmem:[#allocation2 + $0x8] sm:$0xff] %vm72_vm0, %v2269_v12 }
 0xd89   :  { %2274 = vst.msk [vmem:[#allocation2 + $0x10] sm:$0xff] %vm72_vm0, %v2270_v29  ;;  %2275 = vst.msk [vmem:[#allocation2 + $0x18] sm:$0xff] %vm72_vm0, %v2271_v27 }
 0xd8a   :  { %2849 = shalt.err (!%p2846_p4)
}
 0xd8b   :  { %s2850_s0 = scalar_lea.hbm %s3668_s7, 512 }
 0xd8c   :  { %p2851_p5 = scmp.ne.s32.totalorder %s3668_s7, %s2850_s0  ;;  %p2854_p6 = scmp.lt.u32.totalorder %s2850_s0, %s3668_s7 }
 0xd8e   :  { %p2856_p7 = pnand %p2854_p6, %p2851_p5 }
 0xd90   :  { %2859 = shalt.err (!%p2856_p7)
}
 0xd91   :  { %s2875_s19 = smov 128  }
 0xd92   :  { %2287 = dma.vmem_to_hbm [thread:$0]  %s2282_s30, 512, %s3668_s7, [#allocation3], %s2875_s19, %s2875_s19, %s2863_s23  }
 0xd93   :  { %2860 = dma.done.wait [#allocation3], 512  }
 0xd94   :  { %2861 = vsyncadd [#allocation3], 4294966784 }
 0xd95   :  { %2291 = vsyncpa [#allocation3], 1 }

</bundles_post_ra>
